<compile_context>
chip_gen: v7x
topology: tpu7x:2x2x1
jax: 0.10.0
libtpu: 0.0.40
codegen_flags: <defaults>
</compile_context>

<pallas_src>
import jax
import jax.numpy as jnp
from jax import lax
from jax.experimental import pallas as pl
from jax.experimental.pallas import tpu as pltpu

_LANE = 128      # f32 lane width
_SUBLANE = 8     # f32 sublane count


def _round_up(n, m):
    return ((n + m - 1) // m) * m


def _decoder_kernel(x_ref,      # (T, Bp, Ip)   time-major, padded input
                    wd_ref,     # (Ip, Hp)      input_dense.weight^T (padded)
                    bd_ref,     # (1, Hp)       input_dense.bias (padded)
                    wih_ref,    # (Hp, 3*Hp)    W_ih^T, lane-aligned [r|z|n] blocks
                    whh_ref,    # (Hp, 3*Hp)    W_hh^T, lane-aligned [r|z|n] blocks
                    bih_ref,    # (1, 3*Hp)
                    bhh_ref,    # (1, 3*Hp)
                    h0_ref,     # (Bp, Hp)      initial hidden state
                    out_ref,    # (T, Bp, Hp)   GRU outputs (time-major)
                    hT_ref,     # (Bp, Hp)      final hidden state
                    gates_ref): # scratch VMEM  (T, Bp, 3*Hp)
    T, Bp, Ip = x_ref.shape
    Hp = wd_ref.shape[1]

    # ---- Precompute all input-side gate pre-activations as flat 2D matmuls.
    #   (T*Bp, Ip) @ (Ip, Hp)   -> dense activations
    #   (T*Bp, Hp) @ (Hp, 3*Hp) -> W_ih gates
    x2 = x_ref[...].reshape(T * Bp, Ip)
    xd2 = jnp.dot(x2, wd_ref[...], preferred_element_type=jnp.float32) + bd_ref[...]
    g2 = jnp.dot(xd2, wih_ref[...], preferred_element_type=jnp.float32) + bih_ref[...]
    gates_ref[...] = g2.reshape(T, Bp, 3 * Hp)   # stage in VMEM scratch

    whh = whh_ref[...]
    bhh = bhh_ref[...]

    def body(t, h):
        gx = gates_ref[pl.ds(t, 1)][0]                       # (Bp, 3*Hp) VMEM load
        gh = jnp.dot(h, whh, preferred_element_type=jnp.float32) + bhh
        # Lane-aligned gate blocks (Hp is a multiple of 128).
        r = jax.nn.sigmoid(gx[:, 0 * Hp:1 * Hp] + gh[:, 0 * Hp:1 * Hp])
        z = jax.nn.sigmoid(gx[:, 1 * Hp:2 * Hp] + gh[:, 1 * Hp:2 * Hp])
        n = jnp.tanh(gx[:, 2 * Hp:3 * Hp] + r * gh[:, 2 * Hp:3 * Hp])
        h_new = (1.0 - z) * n + z * h
        out_ref[pl.ds(t, 1)] = h_new[None].astype(out_ref.dtype)
        return h_new

    # T is static -> fully unrolled recurrent loop.
    h_final = lax.fori_loop(0, T, body, h0_ref[...].astype(jnp.float32),
                            unroll=True)
    hT_ref[...] = h_final.astype(hT_ref.dtype)


@jax.jit
def decoder_forward(x, state, params):
    """x: (B, T, inputs_size) f32; state: (1, B, H) f32 (PyTorch convention)."""
    B, T, I = x.shape
    H = params['wd'].shape[0]
    Hp = _round_up(H, _LANE)
    Ip = _round_up(I, _LANE)
    Bp = _round_up(B, _SUBLANE)

    f32 = jnp.float32

    # ---- Pre-transpose + zero-pad parameters (once, outside the kernel).
    wd_t = jnp.zeros((Ip, Hp), f32).at[:I, :H].set(params['wd'].T)
    bd_p = jnp.zeros((1, Hp), f32).at[:, :H].set(params['bd'])

    def gate_weight(w):  # (3H, H) -> (Hp, 3*Hp), each gate block lane-aligned
        wt = jnp.zeros((Hp, 3, Hp), f32)
        wt = wt.at[:H, :, :H].set(jnp.transpose(w.reshape(3, H, H), (2, 0, 1)))
        return wt.reshape(Hp, 3 * Hp)

    def gate_bias(b):    # (1, 3H) -> (1, 3*Hp)
        bp = jnp.zeros((1, 3, Hp), f32)
        bp = bp.at[:, :, :H].set(b.reshape(1, 3, H))
        return bp.reshape(1, 3 * Hp)

    wih_t = gate_weight(params['wih'])
    whh_t = gate_weight(params['whh'])
    bih_p = gate_bias(params['bih'])
    bhh_p = gate_bias(params['bhh'])

    # Input: batch-first -> time-major, zero-padded to (T, Bp, Ip).
    x_tm = jnp.zeros((T, Bp, Ip), f32).at[:, :B, :I].set(
        jnp.transpose(x, (1, 0, 2)))
    h0 = jnp.zeros((Bp, Hp), f32).at[:B, :H].set(state[0])

    vmem = pl.BlockSpec(memory_space=pltpu.MemorySpace.VMEM)
    out_tm, h_last = pl.pallas_call(
        _decoder_kernel,
        out_shape=(jax.ShapeDtypeStruct((T, Bp, Hp), f32),
                   jax.ShapeDtypeStruct((Bp, Hp), f32)),
        in_specs=[vmem] * 8,
        out_specs=(vmem, vmem),
        scratch_shapes=[pltpu.VMEM((T, Bp, 3 * Hp), f32)],
    )(x_tm, wd_t, bd_p, wih_t, whh_t, bih_p, bhh_p, h0)

    output = jnp.transpose(out_tm[:, :B, :H], (1, 0, 2))   # (B, T, H) batch_first
    return output, h_last[:B, :H][None]                    # state: (1, B, H)


def init_decoder_params(key, inputs_size, hidden_size):
    """Deterministic init mimicking PyTorch defaults (uniform +-1/sqrt(fan))."""
    H, I = hidden_size, inputs_size
    k = jax.random.split(key, 6)
    bnd_d = 1.0 / (I ** 0.5)
    bnd_r = 1.0 / (H ** 0.5)
    u = lambda kk, shape, b: jax.random.uniform(kk, shape, jnp.float32, -b, b)
    return {
        'wd':  u(k[0], (H, I), bnd_d),        # input_dense.weight
        'bd':  u(k[1], (1, H), bnd_d),        # input_dense.bias
        'wih': u(k[2], (3 * H, H), bnd_r),    # rnn.weight_ih_l0  (r|z|n)
        'whh': u(k[3], (3 * H, H), bnd_r),    # rnn.weight_hh_l0  (r|z|n)
        'bih': u(k[4], (1, 3 * H), bnd_r),    # rnn.bias_ih_l0
        'bhh': u(k[5], (1, 3 * H), bnd_r),    # rnn.bias_hh_l0
    }


def _reference(x, state, p):
    """Pure-JAX reference of Linear + PyTorch-style GRU (r|z|n gate order)."""
    H = p['wd'].shape[0]
    xd = x @ p['wd'].T + p['bd'][0]
    h = state[0]
    outs = []
    for t in range(x.shape[1]):
        gx = xd[:, t] @ p['wih'].T + p['bih'][0]
        gh = h @ p['whh'].T + p['bhh'][0]
        r = jax.nn.sigmoid(gx[:, :H] + gh[:, :H])
        z = jax.nn.sigmoid(gx[:, H:2 * H] + gh[:, H:2 * H])
        n = jnp.tanh(gx[:, 2 * H:] + r * gh[:, 2 * H:])
        h = (1.0 - z) * n + z * h
        outs.append(h)
    return jnp.stack(outs, axis=1), h[None]


if __name__ == "__main__":
    B, T, INPUTS_SIZE, HIDDEN = 2, 8, 16, 32

    root = jax.random.PRNGKey(0)
    kx, kh, kp = jax.random.split(root, 3)
    x = jax.random.normal(kx, (B, T, INPUTS_SIZE), jnp.float32)
    state = jax.random.normal(kh, (1, B, HIDDEN), jnp.float32)
    params = init_decoder_params(kp, INPUTS_SIZE, HIDDEN)

    out, new_state = decoder_forward(x, state, params)
    jax.block_until_ready((out, new_state))

    ref_out, ref_state = _reference(x, state, params)
    assert out.shape == (B, T, HIDDEN) and new_state.shape == (1, B, HIDDEN)
    assert jnp.allclose(out, ref_out, atol=1e-5, rtol=1e-5)
    assert jnp.allclose(new_state, ref_state, atol=1e-5, rtol=1e-5)

    print("KERNEL_OK")
</pallas_src>

<mosaic_0001>
module attributes {stable_mosaic.version = 11 : i64} {
  func.func @_decoder_kernel(%arg0: memref<8x8x128xf32, #tpu.memory_space<vmem>>, %arg1: memref<128x128xf32, #tpu.memory_space<vmem>>, %arg2: memref<1x128xf32, #tpu.memory_space<vmem>>, %arg3: memref<128x384xf32, #tpu.memory_space<vmem>>, %arg4: memref<128x384xf32, #tpu.memory_space<vmem>>, %arg5: memref<1x384xf32, #tpu.memory_space<vmem>>, %arg6: memref<1x384xf32, #tpu.memory_space<vmem>>, %arg7: memref<8x128xf32, #tpu.memory_space<vmem>>, %arg8: memref<8x8x128xf32, #tpu.memory_space<vmem>>, %arg9: memref<8x128xf32, #tpu.memory_space<vmem>>, %arg10: memref<8x8x384xf32, #tpu.memory_space<vmem>>) attributes {dimension_semantics = [], scalar_prefetch = 0 : i64, scratch_operands = 1 : i64, tpu.core_type = #tpu.core_type<tc>} {
    %c0 = arith.constant 0 : index
    %c0_0 = arith.constant 0 : index
    %c0_1 = arith.constant 0 : index
    %0 = vector.load %arg0[%c0, %c0_0, %c0_1] : memref<8x8x128xf32, #tpu.memory_space<vmem>>, vector<8x8x128xf32>
    %1 = vector.shape_cast %0 : vector<8x8x128xf32> to vector<64x128xf32>
    %c0_2 = arith.constant 0 : index
    %c0_3 = arith.constant 0 : index
    %2 = vector.load %arg1[%c0_2, %c0_3] : memref<128x128xf32, #tpu.memory_space<vmem>>, vector<128x128xf32>
    %cst = arith.constant dense<0.000000e+00> : vector<64x128xf32>
    %3 = tpu.matmul %1, %2, %cst {dimension_numbers = #tpu.dot_dimension_numbers<[1], [0], [0], [1], [0, 0, 1, 1], [], []>} : vector<64x128xf32>, vector<128x128xf32>, vector<64x128xf32> -> vector<64x128xf32>
    %c0_4 = arith.constant 0 : index
    %c0_5 = arith.constant 0 : index
    %4 = vector.load %arg2[%c0_4, %c0_5] : memref<1x128xf32, #tpu.memory_space<vmem>>, vector<1x128xf32>
    %5 = vector.broadcast %4 : vector<1x128xf32> to vector<64x128xf32>
    %6 = arith.addf %3, %5 : vector<64x128xf32>
    %c0_6 = arith.constant 0 : index
    %c0_7 = arith.constant 0 : index
    %7 = vector.load %arg3[%c0_6, %c0_7] : memref<128x384xf32, #tpu.memory_space<vmem>>, vector<128x384xf32>
    %cst_8 = arith.constant dense<0.000000e+00> : vector<64x384xf32>
    %8 = tpu.matmul %6, %7, %cst_8 {dimension_numbers = #tpu.dot_dimension_numbers<[1], [0], [0], [1], [0, 0, 1, 1], [], []>} : vector<64x128xf32>, vector<128x384xf32>, vector<64x384xf32> -> vector<64x384xf32>
    %c0_9 = arith.constant 0 : index
    %c0_10 = arith.constant 0 : index
    %9 = vector.load %arg5[%c0_9, %c0_10] : memref<1x384xf32, #tpu.memory_space<vmem>>, vector<1x384xf32>
    %10 = vector.broadcast %9 : vector<1x384xf32> to vector<64x384xf32>
    %11 = arith.addf %8, %10 : vector<64x384xf32>
    %12 = vector.shape_cast %11 : vector<64x384xf32> to vector<8x8x384xf32>
    %c0_11 = arith.constant 0 : index
    %c0_12 = arith.constant 0 : index
    %c0_13 = arith.constant 0 : index
    %13 = vector.load %arg10[%c0_11, %c0_12, %c0_13] : memref<8x8x384xf32, #tpu.memory_space<vmem>>, vector<8x8x384xf32>
    tpu.vector_store %arg10[%c0_11, %c0_12, %c0_13], %12 {strides = array<i32>} : memref<8x8x384xf32, #tpu.memory_space<vmem>>, vector<8x8x384xf32>,
    %c0_14 = arith.constant 0 : index
    %c0_15 = arith.constant 0 : index
    %14 = vector.load %arg4[%c0_14, %c0_15] : memref<128x384xf32, #tpu.memory_space<vmem>>, vector<128x384xf32>
    %c0_16 = arith.constant 0 : index
    %c0_17 = arith.constant 0 : index
    %15 = vector.load %arg6[%c0_16, %c0_17] : memref<1x384xf32, #tpu.memory_space<vmem>>, vector<1x384xf32>
    %c0_18 = arith.constant 0 : index
    %c0_19 = arith.constant 0 : index
    %16 = vector.load %arg7[%c0_18, %c0_19] : memref<8x128xf32, #tpu.memory_space<vmem>>, vector<8x128xf32>
    %c0_i32 = arith.constant 0 : i32
    %17 = arith.index_cast %c0_i32 : i32 to index
    %c0_20 = arith.constant 0 : index
    %c0_21 = arith.constant 0 : index
    %18 = vector.load %arg10[%17, %c0_20, %c0_21] : memref<8x8x384xf32, #tpu.memory_space<vmem>>, vector<1x8x384xf32>
    %19 = vector.shape_cast %18 : vector<1x8x384xf32> to vector<8x384xf32>
    %cst_22 = arith.constant dense<0.000000e+00> : vector<8x384xf32>
    %20 = tpu.matmul %16, %14, %cst_22 {dimension_numbers = #tpu.dot_dimension_numbers<[1], [0], [0], [1], [0, 0, 1, 1], [], []>} : vector<8x128xf32>, vector<128x384xf32>, vector<8x384xf32> -> vector<8x384xf32>
    %21 = vector.broadcast %15 : vector<1x384xf32> to vector<8x384xf32>
    %22 = arith.addf %20, %21 : vector<8x384xf32>
    %23 = vector.extract_strided_slice %19 {offsets = [0, 0], sizes = [8, 128], strides = [1, 1]} : vector<8x384xf32> to vector<8x128xf32>
    %24 = vector.extract_strided_slice %22 {offsets = [0, 0], sizes = [8, 128], strides = [1, 1]} : vector<8x384xf32> to vector<8x128xf32>
    %25 = arith.addf %23, %24 : vector<8x128xf32>
    %26 = arith.negf %25 : vector<8x128xf32>
    %27 = math.exp %26 : vector<8x128xf32>
    %cst_23 = arith.constant 1.000000e+00 : f32
    %28 = vector.broadcast %cst_23 : f32 to vector<8x128xf32>
    %29 = arith.addf %28, %27 : vector<8x128xf32>
    %30 = arith.divf %28, %29 : vector<8x128xf32>
    %31 = vector.extract_strided_slice %19 {offsets = [0, 128], sizes = [8, 128], strides = [1, 1]} : vector<8x384xf32> to vector<8x128xf32>
    %32 = vector.extract_strided_slice %22 {offsets = [0, 128], sizes = [8, 128], strides = [1, 1]} : vector<8x384xf32> to vector<8x128xf32>
    %33 = arith.addf %31, %32 : vector<8x128xf32>
    %34 = arith.negf %33 : vector<8x128xf32>
    %35 = math.exp %34 : vector<8x128xf32>
    %cst_24 = arith.constant 1.000000e+00 : f32
    %36 = vector.broadcast %cst_24 : f32 to vector<8x128xf32>
    %37 = arith.addf %36, %35 : vector<8x128xf32>
    %38 = arith.divf %36, %37 : vector<8x128xf32>
    %39 = vector.extract_strided_slice %19 {offsets = [0, 256], sizes = [8, 128], strides = [1, 1]} : vector<8x384xf32> to vector<8x128xf32>
    %40 = vector.extract_strided_slice %22 {offsets = [0, 256], sizes = [8, 128], strides = [1, 1]} : vector<8x384xf32> to vector<8x128xf32>
    %41 = arith.mulf %30, %40 : vector<8x128xf32>
    %42 = arith.addf %39, %41 : vector<8x128xf32>
    %43 = math.tanh %42 : vector<8x128xf32>
    %cst_25 = arith.constant 1.000000e+00 : f32
    %44 = vector.broadcast %cst_25 : f32 to vector<8x128xf32>
    %45 = arith.subf %44, %38 : vector<8x128xf32>
    %46 = arith.mulf %45, %43 : vector<8x128xf32>
    %47 = arith.mulf %38, %16 : vector<8x128xf32>
    %48 = arith.addf %46, %47 : vector<8x128xf32>
    %49 = vector.shape_cast %48 : vector<8x128xf32> to vector<1x8x128xf32>
    %50 = arith.index_cast %c0_i32 : i32 to index
    %c0_26 = arith.constant 0 : index
    %c0_27 = arith.constant 0 : index
    %51 = vector.load %arg8[%50, %c0_26, %c0_27] : memref<8x8x128xf32, #tpu.memory_space<vmem>>, vector<1x8x128xf32>
    tpu.vector_store %arg8[%50, %c0_26, %c0_27], %49 {strides = array<i32>} : memref<8x8x128xf32, #tpu.memory_space<vmem>>, vector<1x8x128xf32>,
    %c1_i32 = arith.constant 1 : i32
    %52 = arith.index_cast %c1_i32 : i32 to index
    %c0_28 = arith.constant 0 : index
    %c0_29 = arith.constant 0 : index
    %53 = vector.load %arg10[%52, %c0_28, %c0_29] : memref<8x8x384xf32, #tpu.memory_space<vmem>>, vector<1x8x384xf32>
    %54 = vector.shape_cast %53 : vector<1x8x384xf32> to vector<8x384xf32>
    %cst_30 = arith.constant dense<0.000000e+00> : vector<8x384xf32>
    %55 = tpu.matmul %48, %14, %cst_30 {dimension_numbers = #tpu.dot_dimension_numbers<[1], [0], [0], [1], [0, 0, 1, 1], [], []>} : vector<8x128xf32>, vector<128x384xf32>, vector<8x384xf32> -> vector<8x384xf32>
    %56 = vector.broadcast %15 : vector<1x384xf32> to vector<8x384xf32>
    %57 = arith.addf %55, %56 : vector<8x384xf32>
    %58 = vector.extract_strided_slice %54 {offsets = [0, 0], sizes = [8, 128], strides = [1, 1]} : vector<8x384xf32> to vector<8x128xf32>
    %59 = vector.extract_strided_slice %57 {offsets = [0, 0], sizes = [8, 128], strides = [1, 1]} : vector<8x384xf32> to vector<8x128xf32>
    %60 = arith.addf %58, %59 : vector<8x128xf32>
    %61 = arith.negf %60 : vector<8x128xf32>
    %62 = math.exp %61 : vector<8x128xf32>
    %cst_31 = arith.constant 1.000000e+00 : f32
    %63 = vector.broadcast %cst_31 : f32 to vector<8x128xf32>
    %64 = arith.addf %63, %62 : vector<8x128xf32>
    %65 = arith.divf %63, %64 : vector<8x128xf32>
    %66 = vector.extract_strided_slice %54 {offsets = [0, 128], sizes = [8, 128], strides = [1, 1]} : vector<8x384xf32> to vector<8x128xf32>
    %67 = vector.extract_strided_slice %57 {offsets = [0, 128], sizes = [8, 128], strides = [1, 1]} : vector<8x384xf32> to vector<8x128xf32>
    %68 = arith.addf %66, %67 : vector<8x128xf32>
    %69 = arith.negf %68 : vector<8x128xf32>
    %70 = math.exp %69 : vector<8x128xf32>
    %cst_32 = arith.constant 1.000000e+00 : f32
    %71 = vector.broadcast %cst_32 : f32 to vector<8x128xf32>
    %72 = arith.addf %71, %70 : vector<8x128xf32>
    %73 = arith.divf %71, %72 : vector<8x128xf32>
    %74 = vector.extract_strided_slice %54 {offsets = [0, 256], sizes = [8, 128], strides = [1, 1]} : vector<8x384xf32> to vector<8x128xf32>
    %75 = vector.extract_strided_slice %57 {offsets = [0, 256], sizes = [8, 128], strides = [1, 1]} : vector<8x384xf32> to vector<8x128xf32>
    %76 = arith.mulf %65, %75 : vector<8x128xf32>
    %77 = arith.addf %74, %76 : vector<8x128xf32>
    %78 = math.tanh %77 : vector<8x128xf32>
    %cst_33 = arith.constant 1.000000e+00 : f32
    %79 = vector.broadcast %cst_33 : f32 to vector<8x128xf32>
    %80 = arith.subf %79, %73 : vector<8x128xf32>
    %81 = arith.mulf %80, %78 : vector<8x128xf32>
    %82 = arith.mulf %73, %48 : vector<8x128xf32>
    %83 = arith.addf %81, %82 : vector<8x128xf32>
    %84 = vector.shape_cast %83 : vector<8x128xf32> to vector<1x8x128xf32>
    %85 = arith.index_cast %c1_i32 : i32 to index
    %c0_34 = arith.constant 0 : index
    %c0_35 = arith.constant 0 : index
    %86 = vector.load %arg8[%85, %c0_34, %c0_35] : memref<8x8x128xf32, #tpu.memory_space<vmem>>, vector<1x8x128xf32>
    tpu.vector_store %arg8[%85, %c0_34, %c0_35], %84 {strides = array<i32>} : memref<8x8x128xf32, #tpu.memory_space<vmem>>, vector<1x8x128xf32>,
    %c2_i32 = arith.constant 2 : i32
    %87 = arith.index_cast %c2_i32 : i32 to index
    %c0_36 = arith.constant 0 : index
    %c0_37 = arith.constant 0 : index
    %88 = vector.load %arg10[%87, %c0_36, %c0_37] : memref<8x8x384xf32, #tpu.memory_space<vmem>>, vector<1x8x384xf32>
    %89 = vector.shape_cast %88 : vector<1x8x384xf32> to vector<8x384xf32>
    %cst_38 = arith.constant dense<0.000000e+00> : vector<8x384xf32>
    %90 = tpu.matmul %83, %14, %cst_38 {dimension_numbers = #tpu.dot_dimension_numbers<[1], [0], [0], [1], [0, 0, 1, 1], [], []>} : vector<8x128xf32>, vector<128x384xf32>, vector<8x384xf32> -> vector<8x384xf32>
    %91 = vector.broadcast %15 : vector<1x384xf32> to vector<8x384xf32>
    %92 = arith.addf %90, %91 : vector<8x384xf32>
    %93 = vector.extract_strided_slice %89 {offsets = [0, 0], sizes = [8, 128], strides = [1, 1]} : vector<8x384xf32> to vector<8x128xf32>
    %94 = vector.extract_strided_slice %92 {offsets = [0, 0], sizes = [8, 128], strides = [1, 1]} : vector<8x384xf32> to vector<8x128xf32>
    %95 = arith.addf %93, %94 : vector<8x128xf32>
    %96 = arith.negf %95 : vector<8x128xf32>
    %97 = math.exp %96 : vector<8x128xf32>
    %cst_39 = arith.constant 1.000000e+00 : f32
    %98 = vector.broadcast %cst_39 : f32 to vector<8x128xf32>
    %99 = arith.addf %98, %97 : vector<8x128xf32>
    %100 = arith.divf %98, %99 : vector<8x128xf32>
    %101 = vector.extract_strided_slice %89 {offsets = [0, 128], sizes = [8, 128], strides = [1, 1]} : vector<8x384xf32> to vector<8x128xf32>
    %102 = vector.extract_strided_slice %92 {offsets = [0, 128], sizes = [8, 128], strides = [1, 1]} : vector<8x384xf32> to vector<8x128xf32>
    %103 = arith.addf %101, %102 : vector<8x128xf32>
    %104 = arith.negf %103 : vector<8x128xf32>
    %105 = math.exp %104 : vector<8x128xf32>
    %cst_40 = arith.constant 1.000000e+00 : f32
    %106 = vector.broadcast %cst_40 : f32 to vector<8x128xf32>
    %107 = arith.addf %106, %105 : vector<8x128xf32>
    %108 = arith.divf %106, %107 : vector<8x128xf32>
    %109 = vector.extract_strided_slice %89 {offsets = [0, 256], sizes = [8, 128], strides = [1, 1]} : vector<8x384xf32> to vector<8x128xf32>
    %110 = vector.extract_strided_slice %92 {offsets = [0, 256], sizes = [8, 128], strides = [1, 1]} : vector<8x384xf32> to vector<8x128xf32>
    %111 = arith.mulf %100, %110 : vector<8x128xf32>
    %112 = arith.addf %109, %111 : vector<8x128xf32>
    %113 = math.tanh %112 : vector<8x128xf32>
    %cst_41 = arith.constant 1.000000e+00 : f32
    %114 = vector.broadcast %cst_41 : f32 to vector<8x128xf32>
    %115 = arith.subf %114, %108 : vector<8x128xf32>
    %116 = arith.mulf %115, %113 : vector<8x128xf32>
    %117 = arith.mulf %108, %83 : vector<8x128xf32>
    %118 = arith.addf %116, %117 : vector<8x128xf32>
    %119 = vector.shape_cast %118 : vector<8x128xf32> to vector<1x8x128xf32>
    %120 = arith.index_cast %c2_i32 : i32 to index
    %c0_42 = arith.constant 0 : index
    %c0_43 = arith.constant 0 : index
    %121 = vector.load %arg8[%120, %c0_42, %c0_43] : memref<8x8x128xf32, #tpu.memory_space<vmem>>, vector<1x8x128xf32>
    tpu.vector_store %arg8[%120, %c0_42, %c0_43], %119 {strides = array<i32>} : memref<8x8x128xf32, #tpu.memory_space<vmem>>, vector<1x8x128xf32>,
    %c3_i32 = arith.constant 3 : i32
    %122 = arith.index_cast %c3_i32 : i32 to index
    %c0_44 = arith.constant 0 : index
    %c0_45 = arith.constant 0 : index
    %123 = vector.load %arg10[%122, %c0_44, %c0_45] : memref<8x8x384xf32, #tpu.memory_space<vmem>>, vector<1x8x384xf32>
    %124 = vector.shape_cast %123 : vector<1x8x384xf32> to vector<8x384xf32>
    %cst_46 = arith.constant dense<0.000000e+00> : vector<8x384xf32>
    %125 = tpu.matmul %118, %14, %cst_46 {dimension_numbers = #tpu.dot_dimension_numbers<[1], [0], [0], [1], [0, 0, 1, 1], [], []>} : vector<8x128xf32>, vector<128x384xf32>, vector<8x384xf32> -> vector<8x384xf32>
    %126 = vector.broadcast %15 : vector<1x384xf32> to vector<8x384xf32>
    %127 = arith.addf %125, %126 : vector<8x384xf32>
    %128 = vector.extract_strided_slice %124 {offsets = [0, 0], sizes = [8, 128], strides = [1, 1]} : vector<8x384xf32> to vector<8x128xf32>
    %129 = vector.extract_strided_slice %127 {offsets = [0, 0], sizes = [8, 128], strides = [1, 1]} : vector<8x384xf32> to vector<8x128xf32>
    %130 = arith.addf %128, %129 : vector<8x128xf32>
    %131 = arith.negf %130 : vector<8x128xf32>
    %132 = math.exp %131 : vector<8x128xf32>
    %cst_47 = arith.constant 1.000000e+00 : f32
    %133 = vector.broadcast %cst_47 : f32 to vector<8x128xf32>
    %134 = arith.addf %133, %132 : vector<8x128xf32>
    %135 = arith.divf %133, %134 : vector<8x128xf32>
    %136 = vector.extract_strided_slice %124 {offsets = [0, 128], sizes = [8, 128], strides = [1, 1]} : vector<8x384xf32> to vector<8x128xf32>
    %137 = vector.extract_strided_slice %127 {offsets = [0, 128], sizes = [8, 128], strides = [1, 1]} : vector<8x384xf32> to vector<8x128xf32>
    %138 = arith.addf %136, %137 : vector<8x128xf32>
    %139 = arith.negf %138 : vector<8x128xf32>
    %140 = math.exp %139 : vector<8x128xf32>
    %cst_48 = arith.constant 1.000000e+00 : f32
    %141 = vector.broadcast %cst_48 : f32 to vector<8x128xf32>
    %142 = arith.addf %141, %140 : vector<8x128xf32>
    %143 = arith.divf %141, %142 : vector<8x128xf32>
    %144 = vector.extract_strided_slice %124 {offsets = [0, 256], sizes = [8, 128], strides = [1, 1]} : vector<8x384xf32> to vector<8x128xf32>
    %145 = vector.extract_strided_slice %127 {offsets = [0, 256], sizes = [8, 128], strides = [1, 1]} : vector<8x384xf32> to vector<8x128xf32>
    %146 = arith.mulf %135, %145 : vector<8x128xf32>
    %147 = arith.addf %144, %146 : vector<8x128xf32>
    %148 = math.tanh %147 : vector<8x128xf32>
    %cst_49 = arith.constant 1.000000e+00 : f32
    %149 = vector.broadcast %cst_49 : f32 to vector<8x128xf32>
    %150 = arith.subf %149, %143 : vector<8x128xf32>
    %151 = arith.mulf %150, %148 : vector<8x128xf32>
    %152 = arith.mulf %143, %118 : vector<8x128xf32>
    %153 = arith.addf %151, %152 : vector<8x128xf32>
    %154 = vector.shape_cast %153 : vector<8x128xf32> to vector<1x8x128xf32>
    %155 = arith.index_cast %c3_i32 : i32 to index
    %c0_50 = arith.constant 0 : index
    %c0_51 = arith.constant 0 : index
    %156 = vector.load %arg8[%155, %c0_50, %c0_51] : memref<8x8x128xf32, #tpu.memory_space<vmem>>, vector<1x8x128xf32>
    tpu.vector_store %arg8[%155, %c0_50, %c0_51], %154 {strides = array<i32>} : memref<8x8x128xf32, #tpu.memory_space<vmem>>, vector<1x8x128xf32>,
    %c4_i32 = arith.constant 4 : i32
    %157 = arith.index_cast %c4_i32 : i32 to index
    %c0_52 = arith.constant 0 : index
    %c0_53 = arith.constant 0 : index
    %158 = vector.load %arg10[%157, %c0_52, %c0_53] : memref<8x8x384xf32, #tpu.memory_space<vmem>>, vector<1x8x384xf32>
    %159 = vector.shape_cast %158 : vector<1x8x384xf32> to vector<8x384xf32>
    %cst_54 = arith.constant dense<0.000000e+00> : vector<8x384xf32>
    %160 = tpu.matmul %153, %14, %cst_54 {dimension_numbers = #tpu.dot_dimension_numbers<[1], [0], [0], [1], [0, 0, 1, 1], [], []>} : vector<8x128xf32>, vector<128x384xf32>, vector<8x384xf32> -> vector<8x384xf32>
    %161 = vector.broadcast %15 : vector<1x384xf32> to vector<8x384xf32>
    %162 = arith.addf %160, %161 : vector<8x384xf32>
    %163 = vector.extract_strided_slice %159 {offsets = [0, 0], sizes = [8, 128], strides = [1, 1]} : vector<8x384xf32> to vector<8x128xf32>
    %164 = vector.extract_strided_slice %162 {offsets = [0, 0], sizes = [8, 128], strides = [1, 1]} : vector<8x384xf32> to vector<8x128xf32>
    %165 = arith.addf %163, %164 : vector<8x128xf32>
    %166 = arith.negf %165 : vector<8x128xf32>
    %167 = math.exp %166 : vector<8x128xf32>
    %cst_55 = arith.constant 1.000000e+00 : f32
    %168 = vector.broadcast %cst_55 : f32 to vector<8x128xf32>
    %169 = arith.addf %168, %167 : vector<8x128xf32>
    %170 = arith.divf %168, %169 : vector<8x128xf32>
    %171 = vector.extract_strided_slice %159 {offsets = [0, 128], sizes = [8, 128], strides = [1, 1]} : vector<8x384xf32> to vector<8x128xf32>
    %172 = vector.extract_strided_slice %162 {offsets = [0, 128], sizes = [8, 128], strides = [1, 1]} : vector<8x384xf32> to vector<8x128xf32>
    %173 = arith.addf %171, %172 : vector<8x128xf32>
    %174 = arith.negf %173 : vector<8x128xf32>
    %175 = math.exp %174 : vector<8x128xf32>
    %cst_56 = arith.constant 1.000000e+00 : f32
    %176 = vector.broadcast %cst_56 : f32 to vector<8x128xf32>
    %177 = arith.addf %176, %175 : vector<8x128xf32>
    %178 = arith.divf %176, %177 : vector<8x128xf32>
    %179 = vector.extract_strided_slice %159 {offsets = [0, 256], sizes = [8, 128], strides = [1, 1]} : vector<8x384xf32> to vector<8x128xf32>
    %180 = vector.extract_strided_slice %162 {offsets = [0, 256], sizes = [8, 128], strides = [1, 1]} : vector<8x384xf32> to vector<8x128xf32>
    %181 = arith.mulf %170, %180 : vector<8x128xf32>
    %182 = arith.addf %179, %181 : vector<8x128xf32>
    %183 = math.tanh %182 : vector<8x128xf32>
    %cst_57 = arith.constant 1.000000e+00 : f32
    %184 = vector.broadcast %cst_57 : f32 to vector<8x128xf32>
    %185 = arith.subf %184, %178 : vector<8x128xf32>
    %186 = arith.mulf %185, %183 : vector<8x128xf32>
    %187 = arith.mulf %178, %153 : vector<8x128xf32>
    %188 = arith.addf %186, %187 : vector<8x128xf32>
    %189 = vector.shape_cast %188 : vector<8x128xf32> to vector<1x8x128xf32>
    %190 = arith.index_cast %c4_i32 : i32 to index
    %c0_58 = arith.constant 0 : index
    %c0_59 = arith.constant 0 : index
    %191 = vector.load %arg8[%190, %c0_58, %c0_59] : memref<8x8x128xf32, #tpu.memory_space<vmem>>, vector<1x8x128xf32>
    tpu.vector_store %arg8[%190, %c0_58, %c0_59], %189 {strides = array<i32>} : memref<8x8x128xf32, #tpu.memory_space<vmem>>, vector<1x8x128xf32>,
    %c5_i32 = arith.constant 5 : i32
    %192 = arith.index_cast %c5_i32 : i32 to index
    %c0_60 = arith.constant 0 : index
    %c0_61 = arith.constant 0 : index
    %193 = vector.load %arg10[%192, %c0_60, %c0_61] : memref<8x8x384xf32, #tpu.memory_space<vmem>>, vector<1x8x384xf32>
    %194 = vector.shape_cast %193 : vector<1x8x384xf32> to vector<8x384xf32>
    %cst_62 = arith.constant dense<0.000000e+00> : vector<8x384xf32>
    %195 = tpu.matmul %188, %14, %cst_62 {dimension_numbers = #tpu.dot_dimension_numbers<[1], [0], [0], [1], [0, 0, 1, 1], [], []>} : vector<8x128xf32>, vector<128x384xf32>, vector<8x384xf32> -> vector<8x384xf32>
    %196 = vector.broadcast %15 : vector<1x384xf32> to vector<8x384xf32>
    %197 = arith.addf %195, %196 : vector<8x384xf32>
    %198 = vector.extract_strided_slice %194 {offsets = [0, 0], sizes = [8, 128], strides = [1, 1]} : vector<8x384xf32> to vector<8x128xf32>
    %199 = vector.extract_strided_slice %197 {offsets = [0, 0], sizes = [8, 128], strides = [1, 1]} : vector<8x384xf32> to vector<8x128xf32>
    %200 = arith.addf %198, %199 : vector<8x128xf32>
    %201 = arith.negf %200 : vector<8x128xf32>
    %202 = math.exp %201 : vector<8x128xf32>
    %cst_63 = arith.constant 1.000000e+00 : f32
    %203 = vector.broadcast %cst_63 : f32 to vector<8x128xf32>
    %204 = arith.addf %203, %202 : vector<8x128xf32>
    %205 = arith.divf %203, %204 : vector<8x128xf32>
    %206 = vector.extract_strided_slice %194 {offsets = [0, 128], sizes = [8, 128], strides = [1, 1]} : vector<8x384xf32> to vector<8x128xf32>
    %207 = vector.extract_strided_slice %197 {offsets = [0, 128], sizes = [8, 128], strides = [1, 1]} : vector<8x384xf32> to vector<8x128xf32>
    %208 = arith.addf %206, %207 : vector<8x128xf32>
    %209 = arith.negf %208 : vector<8x128xf32>
    %210 = math.exp %209 : vector<8x128xf32>
    %cst_64 = arith.constant 1.000000e+00 : f32
    %211 = vector.broadcast %cst_64 : f32 to vector<8x128xf32>
    %212 = arith.addf %211, %210 : vector<8x128xf32>
    %213 = arith.divf %211, %212 : vector<8x128xf32>
    %214 = vector.extract_strided_slice %194 {offsets = [0, 256], sizes = [8, 128], strides = [1, 1]} : vector<8x384xf32> to vector<8x128xf32>
    %215 = vector.extract_strided_slice %197 {offsets = [0, 256], sizes = [8, 128], strides = [1, 1]} : vector<8x384xf32> to vector<8x128xf32>
    %216 = arith.mulf %205, %215 : vector<8x128xf32>
    %217 = arith.addf %214, %216 : vector<8x128xf32>
    %218 = math.tanh %217 : vector<8x128xf32>
    %cst_65 = arith.constant 1.000000e+00 : f32
    %219 = vector.broadcast %cst_65 : f32 to vector<8x128xf32>
    %220 = arith.subf %219, %213 : vector<8x128xf32>
    %221 = arith.mulf %220, %218 : vector<8x128xf32>
    %222 = arith.mulf %213, %188 : vector<8x128xf32>
    %223 = arith.addf %221, %222 : vector<8x128xf32>
    %224 = vector.shape_cast %223 : vector<8x128xf32> to vector<1x8x128xf32>
    %225 = arith.index_cast %c5_i32 : i32 to index
    %c0_66 = arith.constant 0 : index
    %c0_67 = arith.constant 0 : index
    %226 = vector.load %arg8[%225, %c0_66, %c0_67] : memref<8x8x128xf32, #tpu.memory_space<vmem>>, vector<1x8x128xf32>
    tpu.vector_store %arg8[%225, %c0_66, %c0_67], %224 {strides = array<i32>} : memref<8x8x128xf32, #tpu.memory_space<vmem>>, vector<1x8x128xf32>,
    %c6_i32 = arith.constant 6 : i32
    %227 = arith.index_cast %c6_i32 : i32 to index
    %c0_68 = arith.constant 0 : index
    %c0_69 = arith.constant 0 : index
    %228 = vector.load %arg10[%227, %c0_68, %c0_69] : memref<8x8x384xf32, #tpu.memory_space<vmem>>, vector<1x8x384xf32>
    %229 = vector.shape_cast %228 : vector<1x8x384xf32> to vector<8x384xf32>
    %cst_70 = arith.constant dense<0.000000e+00> : vector<8x384xf32>
    %230 = tpu.matmul %223, %14, %cst_70 {dimension_numbers = #tpu.dot_dimension_numbers<[1], [0], [0], [1], [0, 0, 1, 1], [], []>} : vector<8x128xf32>, vector<128x384xf32>, vector<8x384xf32> -> vector<8x384xf32>
    %231 = vector.broadcast %15 : vector<1x384xf32> to vector<8x384xf32>
    %232 = arith.addf %230, %231 : vector<8x384xf32>
    %233 = vector.extract_strided_slice %229 {offsets = [0, 0], sizes = [8, 128], strides = [1, 1]} : vector<8x384xf32> to vector<8x128xf32>
    %234 = vector.extract_strided_slice %232 {offsets = [0, 0], sizes = [8, 128], strides = [1, 1]} : vector<8x384xf32> to vector<8x128xf32>
    %235 = arith.addf %233, %234 : vector<8x128xf32>
    %236 = arith.negf %235 : vector<8x128xf32>
    %237 = math.exp %236 : vector<8x128xf32>
    %cst_71 = arith.constant 1.000000e+00 : f32
    %238 = vector.broadcast %cst_71 : f32 to vector<8x128xf32>
    %239 = arith.addf %238, %237 : vector<8x128xf32>
    %240 = arith.divf %238, %239 : vector<8x128xf32>
    %241 = vector.extract_strided_slice %229 {offsets = [0, 128], sizes = [8, 128], strides = [1, 1]} : vector<8x384xf32> to vector<8x128xf32>
    %242 = vector.extract_strided_slice %232 {offsets = [0, 128], sizes = [8, 128], strides = [1, 1]} : vector<8x384xf32> to vector<8x128xf32>
    %243 = arith.addf %241, %242 : vector<8x128xf32>
    %244 = arith.negf %243 : vector<8x128xf32>
    %245 = math.exp %244 : vector<8x128xf32>
    %cst_72 = arith.constant 1.000000e+00 : f32
    %246 = vector.broadcast %cst_72 : f32 to vector<8x128xf32>
    %247 = arith.addf %246, %245 : vector<8x128xf32>
    %248 = arith.divf %246, %247 : vector<8x128xf32>
    %249 = vector.extract_strided_slice %229 {offsets = [0, 256], sizes = [8, 128], strides = [1, 1]} : vector<8x384xf32> to vector<8x128xf32>
    %250 = vector.extract_strided_slice %232 {offsets = [0, 256], sizes = [8, 128], strides = [1, 1]} : vector<8x384xf32> to vector<8x128xf32>
    %251 = arith.mulf %240, %250 : vector<8x128xf32>
    %252 = arith.addf %249, %251 : vector<8x128xf32>
    %253 = math.tanh %252 : vector<8x128xf32>
    %cst_73 = arith.constant 1.000000e+00 : f32
    %254 = vector.broadcast %cst_73 : f32 to vector<8x128xf32>
    %255 = arith.subf %254, %248 : vector<8x128xf32>
    %256 = arith.mulf %255, %253 : vector<8x128xf32>
    %257 = arith.mulf %248, %223 : vector<8x128xf32>
    %258 = arith.addf %256, %257 : vector<8x128xf32>
    %259 = vector.shape_cast %258 : vector<8x128xf32> to vector<1x8x128xf32>
    %260 = arith.index_cast %c6_i32 : i32 to index
    %c0_74 = arith.constant 0 : index
    %c0_75 = arith.constant 0 : index
    %261 = vector.load %arg8[%260, %c0_74, %c0_75] : memref<8x8x128xf32, #tpu.memory_space<vmem>>, vector<1x8x128xf32>
    tpu.vector_store %arg8[%260, %c0_74, %c0_75], %259 {strides = array<i32>} : memref<8x8x128xf32, #tpu.memory_space<vmem>>, vector<1x8x128xf32>,
    %c7_i32 = arith.constant 7 : i32
    %262 = arith.index_cast %c7_i32 : i32 to index
    %c0_76 = arith.constant 0 : index
    %c0_77 = arith.constant 0 : index
    %263 = vector.load %arg10[%262, %c0_76, %c0_77] : memref<8x8x384xf32, #tpu.memory_space<vmem>>, vector<1x8x384xf32>
    %264 = vector.shape_cast %263 : vector<1x8x384xf32> to vector<8x384xf32>
    %cst_78 = arith.constant dense<0.000000e+00> : vector<8x384xf32>
    %265 = tpu.matmul %258, %14, %cst_78 {dimension_numbers = #tpu.dot_dimension_numbers<[1], [0], [0], [1], [0, 0, 1, 1], [], []>} : vector<8x128xf32>, vector<128x384xf32>, vector<8x384xf32> -> vector<8x384xf32>
    %266 = vector.broadcast %15 : vector<1x384xf32> to vector<8x384xf32>
    %267 = arith.addf %265, %266 : vector<8x384xf32>
    %268 = vector.extract_strided_slice %264 {offsets = [0, 0], sizes = [8, 128], strides = [1, 1]} : vector<8x384xf32> to vector<8x128xf32>
    %269 = vector.extract_strided_slice %267 {offsets = [0, 0], sizes = [8, 128], strides = [1, 1]} : vector<8x384xf32> to vector<8x128xf32>
    %270 = arith.addf %268, %269 : vector<8x128xf32>
    %271 = arith.negf %270 : vector<8x128xf32>
    %272 = math.exp %271 : vector<8x128xf32>
    %cst_79 = arith.constant 1.000000e+00 : f32
    %273 = vector.broadcast %cst_79 : f32 to vector<8x128xf32>
    %274 = arith.addf %273, %272 : vector<8x128xf32>
    %275 = arith.divf %273, %274 : vector<8x128xf32>
    %276 = vector.extract_strided_slice %264 {offsets = [0, 128], sizes = [8, 128], strides = [1, 1]} : vector<8x384xf32> to vector<8x128xf32>
    %277 = vector.extract_strided_slice %267 {offsets = [0, 128], sizes = [8, 128], strides = [1, 1]} : vector<8x384xf32> to vector<8x128xf32>
    %278 = arith.addf %276, %277 : vector<8x128xf32>
    %279 = arith.negf %278 : vector<8x128xf32>
    %280 = math.exp %279 : vector<8x128xf32>
    %cst_80 = arith.constant 1.000000e+00 : f32
    %281 = vector.broadcast %cst_80 : f32 to vector<8x128xf32>
    %282 = arith.addf %281, %280 : vector<8x128xf32>
    %283 = arith.divf %281, %282 : vector<8x128xf32>
    %284 = vector.extract_strided_slice %264 {offsets = [0, 256], sizes = [8, 128], strides = [1, 1]} : vector<8x384xf32> to vector<8x128xf32>
    %285 = vector.extract_strided_slice %267 {offsets = [0, 256], sizes = [8, 128], strides = [1, 1]} : vector<8x384xf32> to vector<8x128xf32>
    %286 = arith.mulf %275, %285 : vector<8x128xf32>
    %287 = arith.addf %284, %286 : vector<8x128xf32>
    %288 = math.tanh %287 : vector<8x128xf32>
    %cst_81 = arith.constant 1.000000e+00 : f32
    %289 = vector.broadcast %cst_81 : f32 to vector<8x128xf32>
    %290 = arith.subf %289, %283 : vector<8x128xf32>
    %291 = arith.mulf %290, %288 : vector<8x128xf32>
    %292 = arith.mulf %283, %258 : vector<8x128xf32>
    %293 = arith.addf %291, %292 : vector<8x128xf32>
    %294 = vector.shape_cast %293 : vector<8x128xf32> to vector<1x8x128xf32>
    %295 = arith.index_cast %c7_i32 : i32 to index
    %c0_82 = arith.constant 0 : index
    %c0_83 = arith.constant 0 : index
    %296 = vector.load %arg8[%295, %c0_82, %c0_83] : memref<8x8x128xf32, #tpu.memory_space<vmem>>, vector<1x8x128xf32>
    tpu.vector_store %arg8[%295, %c0_82, %c0_83], %294 {strides = array<i32>} : memref<8x8x128xf32, #tpu.memory_space<vmem>>, vector<1x8x128xf32>,
    %c8_i32 = arith.constant 8 : i32
    %c0_84 = arith.constant 0 : index
    %c0_85 = arith.constant 0 : index
    %297 = vector.load %arg9[%c0_84, %c0_85] : memref<8x128xf32, #tpu.memory_space<vmem>>, vector<8x128xf32>
    tpu.vector_store %arg9[%c0_84, %c0_85], %293 {strides = array<i32>} : memref<8x128xf32, #tpu.memory_space<vmem>>, vector<8x128xf32>,
    return
  }
}

</mosaic_0001>

<bundles_post_ra>
// kernel: decoder_forward.1
= control target key start
LH: loop header
LB: loop body
LE: loop exit
PB: predicated region body
PF: predicated region fallthrough
CT: control target
= control target key end

     0   :  { %vm3144_vm0 = vmmov 0   ;;  %s4026_s1 = inlined_call_operand.vmem [shape: f32[128,128], index: 1, kind: input, shape index: {}]   ;;  %s4027_s0 = inlined_call_operand.vmem [shape: f32[8,8,128], index: 0, kind: input, shape index: {}]   ;;  %s4028_s3 = inlined_call_operand.vmem [shape: f32[128,384], index: 3, kind: input, shape index: {}]   ;;  %s4029_s4 = inlined_call_operand.vmem [shape: f32[128,384], index: 4, kind: input, shape index: {}]   ;;  %s4030_s2 = inlined_call_operand.vmem [shape: f32[1,128], index: 2, kind: input, shape index: {}]   ;;  %s4031_s7 = inlined_call_operand.vmem [shape: f32[8,128], index: 7, kind: input, shape index: {}]   ;;  %s4032_s5 = inlined_call_operand.vmem [shape: f32[1,384], index: 5, kind: input, shape index: {}]   ;;  %s4033_s6 = inlined_call_operand.vmem [shape: f32[1,384], index: 6, kind: input, shape index: {}]   ;;  %s4034_s8 = inlined_call_operand.vmem [shape: f32[8,8,128], index: 8, kind: output, shape index: {0}]   ;;  %s4035_s9 = inlined_call_operand.vmem [shape: f32[8,128], index: 9, kind: output, shape index: {1}]  }
   0x1   :  { %v39_v0 = vld [vmem:[%s4026_s1] sm:$0xff]  ;;  %v40_v1 = vld [vmem:[%s4026_s1 + $0x8] sm:$0xff]  ;;  %v41_v2 = vld [vmem:[%s4026_s1 + $0x10] sm:$0xff] }
   0x2   :  { %v2467_v3 = vpack.c.bf16 %v40_v1, %v39_v0  ;;  %v42_v4 = vld [vmem:[%s4026_s1 + $0x18] sm:$0xff]  ;;  %v43_v6 = vld [vmem:[%s4026_s1 + $0x20] sm:$0xff]  ;;  %v44_v7 = vld [vmem:[%s4026_s1 + $0x28] sm:$0xff] }
   0x3   :  { %v2471_v5 = vpack.c.bf16 %v42_v4, %v41_v2  ;;  %v2475_v8 = vpack.c.bf16 %v44_v7, %v43_v6  ;;  %v31_v9 = vld [vmem:[%s4027_s0] sm:$0xff]  ;;  %v45_v10 = vld [vmem:[%s4026_s1 + $0x30] sm:$0xff]  ;;  %v46_v11 = vld [vmem:[%s4026_s1 + $0x38] sm:$0xff] }
   0x4   :  { %2468 = vmatprep.subr.bf16.mxu0 %v2467_v3  ;;  %2131 = vmatprep.mubr.f32.mxu0 %v31_v9  ;;  %v168_v12 = vld [vmem:[%s4028_s3 + $0x8] sm:$0xff]  ;;  %v171_v13 = vld [vmem:[%s4028_s3 + $0x20] sm:$0xff]  ;;  %v2479_v15 = vpack.c.bf16 %v46_v11, %v45_v10  ;;  %v170_v19 = vld [vmem:[%s4028_s3 + $0x18] sm:$0xff] }
   0x5   :  { %2470 = vmatpush3.bf16.msra.mxu0 %v2467_v3  ;;  %v167_v14 = vld [vmem:[%s4028_s3] sm:$0xff]  ;;  %v48_v17 = vld [vmem:[%s4026_s1 + $0x48] sm:$0xff]  ;;  %v2499_v18 = vpack.c.bf16 %v171_v13, %v168_v12  ;;  %v174_v21 = vld [vmem:[%s4028_s3 + $0x38] sm:$0xff] }
   0x6   :  { %2472 = vmatprep.subr.bf16.mxu0 %v2471_v5  ;;  %v47_v16 = vld [vmem:[%s4026_s1 + $0x40] sm:$0xff]  ;;  %v2501_v20 = vpack.c.bf16 %v170_v19, %v167_v14  ;;  %v177_v22 = vld [vmem:[%s4028_s3 + $0x50] sm:$0xff]  ;;  %v176_v25 = vld [vmem:[%s4028_s3 + $0x48] sm:$0xff] }
   0x7   :  { %v173_v23 = vld [vmem:[%s4028_s3 + $0x30] sm:$0xff]  ;;  %2500 = vmatprep.subr.bf16.mxu1 %v2499_v18  ;;  %v2503_v24 = vpack.c.bf16 %v177_v22, %v174_v21  ;;  %v180_v27 = vld [vmem:[%s4028_s3 + $0x68] sm:$0xff]  ;;  %v183_v28 = vld [vmem:[%s4028_s3 + $0x80] sm:$0xff]  ;;  %v2483_v29 = vpack.c.bf16 %v48_v17, %v47_v16 }
   0x8   :  { %2502 = vmatpush1.bf16.msra.mxu1 %v2501_v20  ;;  %v2505_v26 = vpack.c.bf16 %v176_v25, %v173_v23  ;;  %v49_v30 = vld [vmem:[%s4026_s1 + $0x50] sm:$0xff]  ;;  %v2507_v31 = vpack.c.bf16 %v183_v28, %v180_v27  ;;  %v179_v32 = vld [vmem:[%s4028_s3 + $0x60] sm:$0xff]  ;;  %v182_v33 = vld [vmem:[%s4028_s3 + $0x78] sm:$0xff] }
   0x9   :  { %2474 = vmatpush3.bf16.msra.mxu0 %v2471_v5  ;;  %2504 = vmatprep.subr.bf16.mxu1 %v2503_v24  ;;  %v50_v34 = vld [vmem:[%s4026_s1 + $0x58] sm:$0xff]  ;;  %v189_v36 = vld [vmem:[%s4028_s3 + $0xb0] sm:$0xff]  ;;  %v2509_v37 = vpack.c.bf16 %v182_v33, %v179_v32  ;;  %v51_v39 = vld [vmem:[%s4026_s1 + $0x60] sm:$0xff] }
   0xa   :  { %2476 = vmatprep.subr.bf16.mxu0 %v2475_v8  ;;  %v186_v35 = vld [vmem:[%s4028_s3 + $0x98] sm:$0xff]  ;;  %v2487_v38 = vpack.c.bf16 %v50_v34, %v49_v30  ;;  %v185_v41 = vld [vmem:[%s4028_s3 + $0x90] sm:$0xff]  ;;  %v188_v42 = vld [vmem:[%s4028_s3 + $0xa8] sm:$0xff] }
   0xb   :  { %v2511_v40 = vpack.c.bf16 %v189_v36, %v186_v35  ;;  %v52_v43 = vld [vmem:[%s4026_s1 + $0x68] sm:$0xff]  ;;  %v195_v45 = vld [vmem:[%s4028_s3 + $0xe0] sm:$0xff]  ;;  %v2513_v46 = vpack.c.bf16 %v188_v42, %v185_v41  ;;  %v53_v48 = vld [vmem:[%s4026_s1 + $0x70] sm:$0xff] }
   0xc   :  { %2506 = vmatpush1.bf16.msra.mxu1 %v2505_v26  ;;  %v192_v44 = vld [vmem:[%s4028_s3 + $0xc8] sm:$0xff]  ;;  %v2491_v47 = vpack.c.bf16 %v52_v43, %v51_v39  ;;  %v191_v50 = vld [vmem:[%s4028_s3 + $0xc0] sm:$0xff]  ;;  %v194_v51 = vld [vmem:[%s4028_s3 + $0xd8] sm:$0xff]  ;;  %v3142_v43 = vmov 0.0  }
   0xd   :  { %2478 = vmatpush3.bf16.msra.mxu0 %v2475_v8  ;;  %2508 = vmatprep.subr.bf16.mxu1 %v2507_v31  ;;  %v2515_v49 = vpack.c.bf16 %v195_v45, %v192_v44  ;;  %v54_v52 = vld [vmem:[%s4026_s1 + $0x78] sm:$0xff]  ;;  %v201_v54 = vld [vmem:[%s4028_s3 + $0x110] sm:$0xff]  ;;  %v2517_v55 = vpack.c.bf16 %v194_v51, %v191_v50  ;;  %v200_v60 = vld [vmem:[%s4028_s3 + $0x108] sm:$0xff]  ;;  %v3143_v44 = vmov 0.0|0.0  }
   0xe   :  { %2480 = vmatprep.subr.bf16.mxu0 %v2479_v15  ;;  %v198_v53 = vld [vmem:[%s4028_s3 + $0xf8] sm:$0xff]  ;;  %v2495_v56 = vpack.c.bf16 %v54_v52, %v53_v48  ;;  %v169_v57 = vld [vmem:[%s4028_s3 + $0x10] sm:$0xff]  ;;  %v172_v61 = vld [vmem:[%s4028_s3 + $0x28] sm:$0xff]  ;;  %296 = vmatprep.mubr.f32.mxu1 %v3142_v43 }
   0xf   :  { %v2519_v58 = vpack.c.bf16 %v201_v54, %v198_v53  ;;  %v197_v59 = vld [vmem:[%s4028_s3 + $0xf0] sm:$0xff]  ;;  %v204_v62 = vld [vmem:[%s4028_s3 + $0x128] sm:$0xff]  ;;  %v207_v63 = vld [vmem:[%s4028_s3 + $0x140] sm:$0xff]  ;;  %v2531_v1 = vpack.c.bf16 %v172_v61, %v169_v57 }
  0x10   :  { %2510 = vmatpush1.bf16.msra.mxu1 %v2509_v37  ;;  %v2521_v0 = vpack.c.bf16 %v200_v60, %v197_v59  ;;  %v175_v2 = vld [vmem:[%s4028_s3 + $0x40] sm:$0xff]  ;;  %v2523_v3 = vpack.c.bf16 %v207_v63, %v204_v62  ;;  %v178_v4 = vld [vmem:[%s4028_s3 + $0x58] sm:$0xff]  ;;  %v213_v8 = vld [vmem:[%s4028_s3 + $0x170] sm:$0xff] }
  0x11   :  { %2482 = vmatpush3.bf16.msra.mxu0 %v2479_v15  ;;  %2512 = vmatprep.subr.bf16.mxu1 %v2511_v40  ;;  %v203_v5 = vld [vmem:[%s4028_s3 + $0x120] sm:$0xff]  ;;  %v206_v6 = vld [vmem:[%s4028_s3 + $0x138] sm:$0xff]  ;;  %v32_v9 = vld [vmem:[%s4027_s0 + $0x8] sm:$0xff]  ;;  %v2535_v11 = vpack.c.bf16 %v178_v4, %v175_v2 }
  0x12   :  { %2484 = vmatprep.subr.bf16.mxu0 %v2483_v29  ;;  %v210_v7 = vld [vmem:[%s4028_s3 + $0x158] sm:$0xff]  ;;  %v33_v10 = vld [vmem:[%s4027_s0 + $0x10] sm:$0xff]  ;;  %v2525_v12 = vpack.c.bf16 %v206_v6, %v203_v5  ;;  %v184_v14 = vld [vmem:[%s4028_s3 + $0x88] sm:$0xff] }
  0x13   :  { %v181_v13 = vld [vmem:[%s4028_s3 + $0x70] sm:$0xff]  ;;  %v2527_v15 = vpack.c.bf16 %v213_v8, %v210_v7  ;;  %v34_v16 = vld [vmem:[%s4027_s0 + $0x18] sm:$0xff]  ;;  %v35_v17 = vld [vmem:[%s4027_s0 + $0x20] sm:$0xff] }
  0x14   :  { %2514 = vmatpush1.bf16.msra.mxu1 %v2513_v46  ;;  %v2539_v18 = vpack.c.bf16 %v184_v14, %v181_v13  ;;  %v187_v19 = vld [vmem:[%s4028_s3 + $0xa0] sm:$0xff]  ;;  %v190_v20 = vld [vmem:[%s4028_s3 + $0xb8] sm:$0xff]  ;;  %v36_v21 = vld [vmem:[%s4027_s0 + $0x28] sm:$0xff] }
  0x15   :  { %2486 = vmatpush3.bf16.msra.mxu0 %v2483_v29  ;;  %2516 = vmatprep.subr.bf16.mxu1 %v2515_v49  ;;  %v37_v22 = vld [vmem:[%s4027_s0 + $0x30] sm:$0xff]  ;;  %v2543_v23 = vpack.c.bf16 %v190_v20, %v187_v19  ;;  %v196_v25 = vld [vmem:[%s4028_s3 + $0xe8] sm:$0xff]  ;;  %v38_v26 = vld [vmem:[%s4027_s0 + $0x38] sm:$0xff] }
  0x16   :  { %2488 = vmatprep.subr.bf16.mxu0 %v2487_v38  ;;  %v193_v24 = vld [vmem:[%s4028_s3 + $0xd0] sm:$0xff]  ;;  %v199_v28 = vld [vmem:[%s4028_s3 + $0x100] sm:$0xff]  ;;  %v202_v29 = vld [vmem:[%s4028_s3 + $0x118] sm:$0xff] }
  0x17   :  { %v2547_v27 = vpack.c.bf16 %v196_v25, %v193_v24  ;;  %v2551_v30 = vpack.c.bf16 %v202_v29, %v199_v28  ;;  %v205_v31 = vld [vmem:[%s4028_s3 + $0x130] sm:$0xff]  ;;  %v208_v32 = vld [vmem:[%s4028_s3 + $0x148] sm:$0xff]  ;;  %v211_v36 = vld [vmem:[%s4028_s3 + $0x160] sm:$0xff] }
  0x18   :  { %2518 = vmatpush1.bf16.msra.mxu1 %v2517_v55  ;;  %v2555_v33 = vpack.c.bf16 %v208_v32, %v205_v31  ;;  %v209_v34 = vld [vmem:[%s4028_s3 + $0x150] sm:$0xff]  ;;  %v212_v35 = vld [vmem:[%s4028_s3 + $0x168] sm:$0xff]  ;;  %v478_v41 = vld [vmem:[%s4029_s4 + $0x20] sm:$0xff] }
  0x19   :  { %2490 = vmatpush3.bf16.msra.mxu0 %v2487_v38  ;;  %2520 = vmatprep.subr.bf16.mxu1 %v2519_v58  ;;  %v2529_v37 = vpack.c.bf16 %v212_v35, %v209_v34  ;;  %v214_v38 = vld [vmem:[%s4028_s3 + $0x178] sm:$0xff]  ;;  %v475_v40 = vld [vmem:[%s4029_s4 + $0x8] sm:$0xff]  ;;  %v474_v45 = vld [vmem:[%s4029_s4] sm:$0xff] }
  0x1a   :  { %2492 = vmatprep.subr.bf16.mxu0 %v2491_v47  ;;  %v2559_v39 = vpack.c.bf16 %v214_v38, %v211_v36  ;;  %v3417_v42 = vpack.c.bf16 %v478_v41, %v475_v40  ;;  %v477_v46 = vld [vmem:[%s4029_s4 + $0x18] sm:$0xff]  ;;  %v484_v49 = vld [vmem:[%s4029_s4 + $0x50] sm:$0xff]  ;;  %v479_v52 = vld [vmem:[%s4029_s4 + $0x28] sm:$0xff] }
  0x1b   :  { %v481_v48 = vld [vmem:[%s4029_s4 + $0x38] sm:$0xff]  ;;  %v476_v51 = vld [vmem:[%s4029_s4 + $0x10] sm:$0xff]  ;;  %v3445_v54 = vpack.c.bf16 %v477_v46, %v474_v45  ;;  %v483_v58 = vld [vmem:[%s4029_s4 + $0x48] sm:$0xff] }
  0x1c   :  { %2522 = vmatpush1.bf16.msra.mxu1 %v2521_v0  ;;  %v480_v57 = vld [vmem:[%s4029_s4 + $0x30] sm:$0xff]  ;;  %v487_v60 = vld [vmem:[%s4029_s4 + $0x68] sm:$0xff]  ;;  %v490_v61 = vld [vmem:[%s4029_s4 + $0x80] sm:$0xff]  ;;  %v3463_v62 = vpack.c.bf16 %v479_v52, %v476_v51 }
  0x1d   :  { %2494 = vmatpush3.bf16.msra.mxu0 %v2491_v47  ;;  %2524 = vmatprep.subr.bf16.mxu1 %v2523_v3  ;;  %v3431_v47 = vld [vmem:[%s4030_s2] ss:$0 sm:$0xff]  ;;  %v3467_v2 = vpack.c.bf16 %v483_v58, %v480_v57  ;;  %v3472_v4 = vpack.c.bf16 %v490_v61, %v487_v60  ;;  %v489_v6 = vld [vmem:[%s4029_s4 + $0x78] sm:$0xff]  ;;  %v496_v8 = vld [vmem:[%s4029_s4 + $0xb0] sm:$0xff] }
  0x1e   :  { %2496 = vmatprep.subr.bf16.mxu0 %v2495_v56  ;;  %v486_v5 = vld [vmem:[%s4029_s4 + $0x60] sm:$0xff]  ;;  %v493_v7 = vld [vmem:[%s4029_s4 + $0x98] sm:$0xff]  ;;  %v499_v19 = vld [vmem:[%s4029_s4 + $0xc8] sm:$0xff] }
  0x1f   :  { %v502_v20 = vld [vmem:[%s4029_s4 + $0xe0] sm:$0xff]  ;;  %v488_v25 = vld [vmem:[%s4029_s4 + $0x70] sm:$0xff]  ;;  %v501_v29 = vld [vmem:[%s4029_s4 + $0xd8] sm:$0xff] }
  0x20   :  { %2526 = vmatpush1.bf16.msra.mxu1 %v2525_v12  ;;  %v3494_v12 = vpack.c.bf16 %v489_v6, %v486_v5  ;;  %v498_v28 = vld [vmem:[%s4029_s4 + $0xc0] sm:$0xff]  ;;  %v505_v32 = vld [vmem:[%s4029_s4 + $0xf8] sm:$0xff]  ;;  %v507_v40 = vld [vmem:[%s4029_s4 + $0x108] sm:$0xff] }
  0x21   :  { %2498 = vmatpush3.bf16.msra.mxu0 %v2495_v56  ;;  %2528 = vmatprep.subr.bf16.mxu1 %v2527_v15  ;;  %v3448_v56 = vpack.c.bf16 %v484_v49, %v481_v48  ;;  %v3549_v35 = vpack.c.bf16 %v501_v29, %v498_v28  ;;  %v494_v36 = vld [vmem:[%s4029_s4 + $0xa0] sm:$0xff]  ;;  %v511_v41 = vld [vmem:[%s4029_s4 + $0x128] sm:$0xff]  ;;  %v500_v48 = vld [vmem:[%s4029_s4 + $0xd0] sm:$0xff] }
  0x22   :  { %2532 = vmatprep.subr.bf16.mxu0 %v2531_v1  ;;  %v514_v45 = vld [vmem:[%s4029_s4 + $0x140] sm:$0xff]  ;;  %v503_v49 = vld [vmem:[%s4029_s4 + $0xe8] sm:$0xff]  ;;  %v513_v52 = vld [vmem:[%s4029_s4 + $0x138] sm:$0xff] }
  0x23   :  { %v510_v51 = vld [vmem:[%s4029_s4 + $0x120] sm:$0xff]  ;;  %v3605_v57 = vpack.c.bf16 %v503_v49, %v500_v48  ;;  %v509_v60 = vld [vmem:[%s4029_s4 + $0x118] sm:$0xff]  ;;  %v512_v5 = vld [vmem:[%s4029_s4 + $0x130] sm:$0xff] }
  0x24   :  { %2132 = vmatmul.mubr.f32.vlgmr.msra.gmra.mrb[0].mxu0 %v32_v9  ;;  %2530 = vmatpush1.bf16.msra.mxu1 %v2529_v37  ;;  %v497_v37 = vld [vmem:[%s4029_s4 + $0xb8] sm:$0xff]  ;;  %v3609_v58 = vpack.c.bf16 %v513_v52, %v510_v51  ;;  %v515_v6 = vld [vmem:[%s4029_s4 + $0x148] sm:$0xff] }
  0x25   :  { %2134 = vmatprep.mubr.f32.mxu0 %v33_v10  ;;  %2534 = vmatpush3.bf16.msra.mxu0 %v2531_v1  ;;  %v482_v10 = vld [vmem:[%s4029_s4 + $0x40] sm:$0xff]  ;;  %v3576_v46 = vpack.c.bf16 %v497_v37, %v494_v36 }
  0x26   :  { %2536 = vmatprep.subr.bf16.mxu0 %v2535_v11  ;;  %2564 = vmatprep.subr.bf16.mxu1 %v3417_v42 }
  0x28   :  { %2135 = vmatmul.mubr.f32.gmra.mrb[2].mxu0 %v34_v16  ;;  %v3500_v16 = vpack.c.bf16 %v496_v8, %v493_v7  ;;  %v3643_v7 = vpack.c.bf16 %v515_v6, %v512_v5  ;;  %v3650_v8 = vld [vmem:[%s4031_s7] sm:$0xff] }
  0x29   :  { %2137 = vmatprep.mubr.f32.mxu0 %v35_v17  ;;  %2538 = vmatpush3.bf16.msra.mxu0 %v2535_v11  ;;  %v485_v11 = vld [vmem:[%s4029_s4 + $0x58] sm:$0xff]  ;;  %v492_v17 = vld [vmem:[%s4029_s4 + $0x90] sm:$0xff] }
  0x2a   :  { %2540 = vmatprep.subr.bf16.mxu0 %v2539_v18 }
  0x2c   :  { %2138 = vmatmul.mubr.f32.gmra.mrb[4].mxu0 %v36_v21  ;;  %v3515_v21 = vpack.c.bf16 %v485_v11, %v482_v10  ;;  %v521_v10 = vld [vmem:[%s4029_s4 + $0x178] sm:$0xff] }
  0x2d   :  { %2140 = vmatprep.mubr.f32.mxu0 %v37_v22  ;;  %2542 = vmatpush3.bf16.msra.mxu0 %v2539_v18  ;;  %v495_v18 = vld [vmem:[%s4029_s4 + $0xa8] sm:$0xff] }
  0x2e   :  { %2544 = vmatprep.subr.bf16.mxu0 %v2543_v23 }
  0x30   :  { %2141 = vmatmul.mubr.f32.gmra.mrb[6].mxu0 %v38_v26  ;;  %v491_v26 = vld [vmem:[%s4029_s4 + $0x88] sm:$0xff] }
  0x31   :  { %2546 = vmatpush3.bf16.msra.mxu0 %v2543_v23  ;;  %v3519_v23 = vpack.c.bf16 %v495_v18, %v492_v17  ;;  %v3545_v34 = vpack.c.bf16 %v491_v26, %v488_v25  ;;  %v215_v17 = vld [vmem:[%s4032_s5] sm:$0x7] }
  0x32   :  { %2548 = vmatprep.subr.bf16.mxu0 %v2547_v27 }
  0x35   :  { %2550 = vmatpush3.bf16.msra.mxu0 %v2547_v27  ;;  %v3528_v27 = vpack.c.bf16 %v502_v20, %v499_v19 }
  0x36   :  { %2552 = vmatprep.subr.bf16.mxu0 %v2551_v30 }
  0x39   :  { %2554 = vmatpush3.bf16.msra.mxu0 %v2551_v30 }
  0x3a   :  { %2556 = vmatprep.subr.bf16.mxu0 %v2555_v33 }
  0x3d   :  { %2558 = vmatpush3.bf16.msra.mxu0 %v2555_v33  ;;  %v508_v33 = vld [vmem:[%s4029_s4 + $0x110] sm:$0xff] }
  0x3e   :  { %2560 = vmatprep.subr.bf16.mxu0 %v2559_v39  ;;  %v3558_v38 = vpack.c.bf16 %v508_v33, %v505_v32 }
  0x41   :  { %2562 = vmatpush3.bf16.msra.mxu0 %v2559_v39  ;;  %v504_v39 = vld [vmem:[%s4029_s4 + $0xf0] sm:$0xff] }
  0x42   :  { %2595 = vmatprep.subr.bf16.mxu0 %v3143_v44 }
  0xf7   :  { %v2133_v50 = vpop.f32.mrb[0].mxu0 }
  0xf8   :  { %v128_v53 = vpop.f32.mrb[1].mxu0  ;;  %v134_v59 = vadd.f32 %v2133_v50, %v3431_v47  ;;  %v3589_v50 = vpack.c.bf16 %v514_v45, %v511_v41  ;;  %v522_v41 = vld [vmem:[%s4033_s6] sm:$0x7] }
  0xf9   :  { %v129_v55 = vadd.f32 %v3431_v47, %v128_v53  ;;  %v517_v53 = vld [vmem:[%s4029_s4 + $0x158] sm:$0xff] }
  0xfb   :  { %297 = vmatmul.mubr.f32.vlgmr.msra.gmra.mrb[0].mxu1 %v129_v55  ;;  %2175 = vmatprep.mubr.f32.mxu0 %v129_v55  ;;  %v2136_v63 = vpop.f32.mrb[2].mxu0  ;;  %v520_v55 = vld [vmem:[%s4029_s4 + $0x170] sm:$0xff] }
  0xfc   :  { %2566 = vmatpush1.bf16.msra.mxu1 %v3445_v54  ;;  %v144_v0 = vadd.f32 %v2136_v63, %v3431_v47  ;;  %2176 = vmatmul.mubr.f32.vlgmr.msra.gmra.mrb[8].mxu0 %v134_v59  ;;  %v138_v1 = vpop.f32.mrb[3].mxu0  ;;  %v3618_v61 = vpack.c.bf16 %v520_v55, %v517_v53  ;;  %v516_v63 = vld [vmem:[%s4029_s4 + $0x150] sm:$0xff] }
  0xfd   :  { %v139_v3 = vadd.f32 %v3431_v47, %v138_v1  ;;  %302 = vmatprep.mubr.f32.mxu1 %v3142_v43  ;;  %2568 = vmatprep.subr.bf16.mxu1 %v3448_v56 }
  0xfe   :  { %2597 = vmatpush3.bf16.msra.mxu0 %v3463_v62 }
  0xff   :  { %303 = vmatmul.mubr.f32.gmra.mrb[2].mxu1 %v134_v59  ;;  %2178 = vmatprep.mubr.f32.mxu0 %v139_v3  ;;  %v2139_v9 = vpop.f32.mrb[4].mxu0  ;;  %v506_v59 = vld [vmem:[%s4029_s4 + $0x100] sm:$0xff] }
 0x100   :  { %2570 = vmatpush1.bf16.msra.mxu1 %v3467_v2  ;;  %2179 = vmatmul.mubr.f32.gmra.mrb[10].mxu0 %v144_v0  ;;  %v148_v13 = vpop.f32.mrb[5].mxu0  ;;  %v154_v14 = vadd.f32 %v2139_v9, %v3431_v47  ;;  %v3628_v1 = vpack.c.bf16 %v509_v60, %v506_v59  ;;  %v518_v9 = vld [vmem:[%s4029_s4 + $0x160] sm:$0xff] }
 0x101   :  { %308 = vmatprep.mubr.f32.mxu1 %v3142_v43  ;;  %2572 = vmatprep.subr.bf16.mxu1 %v3472_v4  ;;  %v149_v15 = vadd.f32 %v3431_v47, %v148_v13  ;;  %v3662_v11 = vpack.c.bf16 %v521_v10, %v518_v9  ;;  %v217_v13 = vlaneseq }
 0x102   :  { %2598 = vmatprep.subr.bf16.mxu0 %v3143_v44 }
 0x103   :  { %309 = vmatmul.mubr.f32.gmra.mrb[4].mxu1 %v139_v3  ;;  %2181 = vmatprep.mubr.f32.mxu0 %v149_v15  ;;  %v2142_v22 = vpop.f32.mrb[6].mxu0 }
 0x104   :  { %2574 = vmatpush1.bf16.msra.mxu1 %v3494_v12  ;;  %314 = vmatprep.mubr.f32.mxu1 %v3142_v43  ;;  %v158_v24 = vpop.f32.mrb[7].mxu0  ;;  %v164_v30 = vadd.f32 %v2142_v22, %v3431_v47 }
 0x105   :  { %2576 = vmatprep.subr.bf16.mxu1 %v3500_v16  ;;  %2182 = vmatmul.mubr.f32.gmra.mrb[12].mxu0 %v154_v14  ;;  %v159_v31 = vadd.f32 %v3431_v47, %v158_v24  ;;  %v3580_v47 = vpack.c.bf16 %v507_v40, %v504_v39 }
 0x106   :  { %2600 = vmatpush3.bf16.msra.mxu0 %v3515_v21 }
 0x107   :  { %315 = vmatmul.mubr.f32.gmra.mrb[6].mxu1 %v144_v0  ;;  %2184 = vmatprep.mubr.f32.mxu0 %v159_v31  ;;  %v519_v0 = vld [vmem:[%s4029_s4 + $0x168] sm:$0xff] }
 0x108   :  { %2578 = vmatpush1.bf16.msra.mxu1 %v3519_v23  ;;  %320 = vmatprep.mubr.f32.mxu1 %v3142_v43  ;;  %v3632_v3 = vpack.c.bf16 %v519_v0, %v516_v63 }
 0x109   :  { %2580 = vmatprep.subr.bf16.mxu1 %v3528_v27  ;;  %2185 = vmatmul.mubr.f32.gmra.mrb[14].mxu0 %v164_v30 }
 0x10a   :  { %2601 = vmatprep.subr.bf16.mxu0 %v3143_v44  ;;  %2219 = vmatprep.mubr.msk.f32.mxu0 %vm3144_vm0, %v3142_v43 }
 0x10b   :  { %321 = vmatmul.mubr.f32.gmra.mrb[8].mxu1 %v149_v15  ;;  %2603 = vmatpush3.bf16.msra.mxu0 %v3545_v34 }
 0x10c   :  { %2582 = vmatpush1.bf16.msra.mxu1 %v3549_v35  ;;  %326 = vmatprep.mubr.f32.mxu1 %v3142_v43 }
 0x10d   :  { %2584 = vmatprep.subr.bf16.mxu1 %v3558_v38  ;;  %2604 = vmatprep.subr.bf16.mxu0 %v3143_v44 }
 0x10f   :  { %327 = vmatmul.mubr.f32.gmra.mrb[10].mxu1 %v154_v14  ;;  %2606 = vmatpush3.bf16.msra.mxu0 %v3576_v46  ;;  %v218_v14 = vshrl.u32 %v217_v13, 7 }
 0x110   :  { %2586 = vmatpush1.bf16.msra.mxu1 %v3580_v47  ;;  %332 = vmatprep.mubr.f32.mxu1 %v3142_v43 }
 0x111   :  { %2588 = vmatprep.subr.bf16.mxu1 %v3589_v50  ;;  %2607 = vmatprep.subr.bf16.mxu0 %v3143_v44  ;;  %v227_v15 = vsub.s32 2, %v218_v14  ;;  %v219_v40 = vsub.s32 0, %v218_v14  ;;  %v223_v45 = vsub.s32 1, %v218_v14 }
 0x113   :  { %333 = vmatmul.mubr.f32.gmra.mrb[12].mxu1 %v159_v31  ;;  %2609 = vmatpush3.bf16.msra.mxu0 %v3605_v57  ;;  %v228_v18 = vrot.slane %v215_v17, %v227_v15  ;;  %v220_v48 = vrot.slane %v215_v17, %v219_v40  ;;  %v531_v49 = vrot.slane %v522_v41, %v219_v40 }
 0x114   :  { %2590 = vmatpush1.bf16.msra.mxu1 %v3609_v58  ;;  %338 = vmatprep.mubr.f32.mxu1 %v3142_v43  ;;  %v224_v51 = vrot.slane %v215_v17, %v223_v45  ;;  %v535_v52 = vrot.slane %v522_v41, %v223_v45  ;;  %v3729_v17 = vrot.slane %v522_v41, %v227_v15 }
 0x115   :  { %2592 = vmatprep.subr.bf16.mxu1 %v3618_v61  ;;  %2610 = vmatprep.subr.bf16.mxu0 %v3143_v44  ;;  %v3723_v53 = vadd.f32 %v531_v49, %v220_v48 }
 0x116   :  { %v3725_v59 = vadd.f32 %v535_v52, %v224_v51 }
 0x117   :  { %339 = vmatmul.mubr.f32.gmra.mrb[14].mxu1 %v164_v30  ;;  %2612 = vmatpush3.bf16.msra.mxu0 %v3628_v1 }
 0x118   :  { %2594 = vmatpush1.bf16.msra.mxu1 %v3632_v3  ;;  %607 = vmatprep.mubr.f32.mxu1 %v3142_v43 }
 0x119   :  { %2613 = vmatprep.subr.bf16.mxu0 %v3143_v44  ;;  %2620 = vmatprep.subr.bf16.mxu1 %v3417_v42 }
 0x11b   :  { %608 = vmatmul.mubr.f32.vlgmr.msra.gmra.mrb[0].mxu1 %v3650_v8  ;;  %2615 = vmatpush3.bf16.msra.mxu0 %v3643_v7 }
 0x11c   :  { %2616 = vmatprep.subr.bf16.mxu0 %v3143_v44  ;;  %2622 = vmatpush1.bf16.msra.mxu1 %v3445_v54 }
 0x11d   :  { %2624 = vmatprep.subr.bf16.mxu1 %v3448_v56  ;;  %774 = vmatprep.mubr.f32.mxu1 %v3142_v43 }
 0x11f   :  { %2618 = vmatpush3.bf16.msra.mxu0 %v3662_v11 }
 0x120   :  { %2651 = vmatprep.subr.bf16.mxu0 %v3143_v44  ;;  %2626 = vmatpush1.bf16.msra.mxu1 %v3467_v2 }
 0x121   :  { %2628 = vmatprep.subr.bf16.mxu1 %v3472_v4 }
 0x122   :  { %2220 = vmatmul.mubr.f32.vlgmr.msra.gmra.mrb[16].mxu0 %v3650_v8 }
 0x123   :  { %2653 = vmatpush3.bf16.msra.mxu0 %v3463_v62  ;;  %2254 = vmatprep.mubr.msk.f32.mxu0 %vm3144_vm0, %v3142_v43 }
 0x124   :  { %2654 = vmatprep.subr.bf16.mxu0 %v3143_v44  ;;  %2630 = vmatpush1.bf16.msra.mxu1 %v3494_v12 }
 0x125   :  { %2632 = vmatprep.subr.bf16.mxu1 %v3500_v16 }
 0x127   :  { %2656 = vmatpush3.bf16.msra.mxu0 %v3515_v21 }
 0x128   :  { %2657 = vmatprep.subr.bf16.mxu0 %v3143_v44  ;;  %2634 = vmatpush1.bf16.msra.mxu1 %v3519_v23 }
 0x129   :  { %2636 = vmatprep.subr.bf16.mxu1 %v3528_v27 }
 0x12b   :  { %2659 = vmatpush3.bf16.msra.mxu0 %v3545_v34 }
 0x12c   :  { %2660 = vmatprep.subr.bf16.mxu0 %v3143_v44  ;;  %2638 = vmatpush1.bf16.msra.mxu1 %v3549_v35 }
 0x12d   :  { %2640 = vmatprep.subr.bf16.mxu1 %v3558_v38 }
 0x12f   :  { %2662 = vmatpush3.bf16.msra.mxu0 %v3576_v46 }
 0x130   :  { %2663 = vmatprep.subr.bf16.mxu0 %v3143_v44  ;;  %2642 = vmatpush1.bf16.msra.mxu1 %v3580_v47 }
 0x131   :  { %2644 = vmatprep.subr.bf16.mxu1 %v3589_v50 }
 0x133   :  { %2665 = vmatpush3.bf16.msra.mxu0 %v3605_v57 }
 0x134   :  { %2666 = vmatprep.subr.bf16.mxu0 %v3143_v44  ;;  %2646 = vmatpush1.bf16.msra.mxu1 %v3609_v58 }
 0x135   :  { %2648 = vmatprep.subr.bf16.mxu1 %v3618_v61 }
 0x137   :  { %2668 = vmatpush3.bf16.msra.mxu0 %v3628_v1 }
 0x138   :  { %2669 = vmatprep.subr.bf16.mxu0 %v3143_v44  ;;  %2650 = vmatpush1.bf16.msra.mxu1 %v3632_v3 }
 0x139   :  { %2676 = vmatprep.subr.bf16.mxu1 %v3417_v42 }
 0x13b   :  { %2671 = vmatpush3.bf16.msra.mxu0 %v3643_v7 }
 0x13c   :  { %2672 = vmatprep.subr.bf16.mxu0 %v3143_v44 }
 0x13f   :  { %2674 = vmatpush3.bf16.msra.mxu0 %v3662_v11 }
 0x140   :  { %2707 = vmatprep.subr.bf16.mxu0 %v3143_v44 }
 0x1cf   :  { %v2177_v19 = vpop.f32.mrb[8].mxu0 }
 0x1d0   :  { %v3706_v20 = vadd.f32 %v2177_v19, %v228_v18  ;;  %v411_v22 = vpop.f32.mrb[9].mxu0 }
 0x1d3   :  { %v2180_v24 = vpop.f32.mrb[10].mxu0 }
 0x1d4   :  { %v3708_v25 = vadd.f32 %v2180_v24, %v228_v18  ;;  %v421_v26 = vpop.f32.mrb[11].mxu0 }
 0x1d5   :  { %v3710_v28 = vadd.f32 %v421_v26, %v228_v18 }
 0x1d8   :  { %v2183_v29 = vpop.f32.mrb[12].mxu0 }
 0x1d9   :  { %v3712_v30 = vadd.f32 %v2183_v29, %v228_v18  ;;  %v431_v31 = vpop.f32.mrb[13].mxu0 }
 0x1da   :  { %v3714_v32 = vadd.f32 %v431_v31, %v228_v18  ;;  %v412_v31 = vadd.f32 %v411_v22, %v228_v18 }
 0x1dc   :  { %v2186_v33 = vpop.f32.mrb[14].mxu0 }
 0x1dd   :  { %v3716_v36 = vadd.f32 %v2186_v33, %v228_v18  ;;  %v441_v37 = vpop.f32.mrb[15].mxu0 }
 0x1de   :  { %v3718_v39 = vadd.f32 %v441_v37, %v228_v18 }
 0x1ee   :  { %v609_v55 = vpop.f32.mrb[0].mxu1 }
 0x1ef   :  { %v3012_v60 = vadd.f32 %v3723_v53, %v609_v55  ;;  %v611_v63 = vpop.f32.mrb[1].mxu1 }
 0x1f0   :  { %v3014_v5 = vadd.f32 %v3725_v59, %v611_v63 }
 0x1f1   :  { %v1892_v0 = vmul.f32 -1.442695, %v3012_v60 }
 0x1f2   :  { %v1893_v9 = vmul.f32 -1.442695, %v3014_v5 }
 0x1f3   :  { %3062 = vpow2.f32 %v1892_v0 }
 0x1f4   :  { %3064 = vpow2.f32 %v1893_v9 }
 0x1f5   :  { %v680_v6 = vpop.f32.mrb[16].mxu0 }
 0x1f6   :  { %v2221_v10 = vpop.f32.mrb[17].mxu0  ;;  %v681_v26 = vadd.f32 %v680_v6, %v3729_v17 }
 0x1fd   :  { %v3063_v13 = vpop.eup %3062 }
 0x1fe   :  { %v688_v14 = vadd.f32 1.0, %v3063_v13  ;;  %v3065_v19 = vpop.eup %3064 }
 0x1ff   :  { %v695_v24 = vadd.f32 1.0, %v3065_v19 }
 0x200   :  { %3066 = vrcp.f32 %v688_v14 }
 0x201   :  { %3068 = vrcp.f32 %v695_v24 }
 0x20a   :  { %v3067_v29 = vpop.eup %3066 }
 0x20b   :  { %v698_v33 = vmul.f32 %v3067_v29, %v681_v26  ;;  %v3069_v40 = vpop.eup %3068 }
 0x20c   :  { %v701_v45 = vsub.f32 1.0, %v3069_v40  ;;  %v703_v51 = vmul.f32 %v3069_v40, %v3650_v8 }
 0x20d   :  { %v699_v37 = vadd.f32 %v698_v33, %v412_v31 }
 0x20f   :  { %3070 = vtanh.f32 %v699_v37 }
 0x219   :  { %v3071_v48 = vpop.eup %3070 }
 0x21a   :  { %v702_v49 = vmul.f32 %v3071_v48, %v701_v45 }
 0x21c   :  { %v3733_v52 = vadd.f32 %v703_v51, %v702_v49 }
 0x21e   :  { %705 = vst [vmem:[%s4034_s8] sm:$0xff] %v3733_v52  ;;  %775 = vmatmul.mubr.f32.vlgmr.msra.gmra.mrb[2].mxu1 %v3733_v52  ;;  %2255 = vmatmul.mubr.f32.vlgmr.msra.gmra.mrb[18].mxu0 %v3733_v52 }
 0x21f   :  { %2678 = vmatpush1.bf16.msra.mxu1 %v3445_v54  ;;  %2709 = vmatpush3.bf16.msra.mxu0 %v3463_v62 }
 0x220   :  { %2680 = vmatprep.subr.bf16.mxu1 %v3448_v56  ;;  %2710 = vmatprep.subr.bf16.mxu0 %v3143_v44 }
 0x221   :  { %942 = vmatprep.mubr.f32.mxu1 %v3142_v43  ;;  %2289 = vmatprep.mubr.msk.f32.mxu0 %vm3144_vm0, %v3142_v43 }
 0x223   :  { %2682 = vmatpush1.bf16.msra.mxu1 %v3467_v2  ;;  %2712 = vmatpush3.bf16.msra.mxu0 %v3515_v21 }
 0x224   :  { %2684 = vmatprep.subr.bf16.mxu1 %v3472_v4  ;;  %2713 = vmatprep.subr.bf16.mxu0 %v3143_v44 }
 0x227   :  { %2686 = vmatpush1.bf16.msra.mxu1 %v3494_v12  ;;  %2715 = vmatpush3.bf16.msra.mxu0 %v3545_v34 }
 0x228   :  { %2688 = vmatprep.subr.bf16.mxu1 %v3500_v16  ;;  %2716 = vmatprep.subr.bf16.mxu0 %v3143_v44 }
 0x22b   :  { %2690 = vmatpush1.bf16.msra.mxu1 %v3519_v23  ;;  %2718 = vmatpush3.bf16.msra.mxu0 %v3576_v46 }
 0x22c   :  { %2692 = vmatprep.subr.bf16.mxu1 %v3528_v27  ;;  %2719 = vmatprep.subr.bf16.mxu0 %v3143_v44 }
 0x22f   :  { %2694 = vmatpush1.bf16.msra.mxu1 %v3549_v35  ;;  %2721 = vmatpush3.bf16.msra.mxu0 %v3605_v57 }
 0x230   :  { %2696 = vmatprep.subr.bf16.mxu1 %v3558_v38  ;;  %2722 = vmatprep.subr.bf16.mxu0 %v3143_v44 }
 0x233   :  { %2698 = vmatpush1.bf16.msra.mxu1 %v3580_v47  ;;  %2724 = vmatpush3.bf16.msra.mxu0 %v3628_v1 }
 0x234   :  { %2700 = vmatprep.subr.bf16.mxu1 %v3589_v50  ;;  %2725 = vmatprep.subr.bf16.mxu0 %v3143_v44 }
 0x237   :  { %2702 = vmatpush1.bf16.msra.mxu1 %v3609_v58  ;;  %2727 = vmatpush3.bf16.msra.mxu0 %v3643_v7 }
 0x238   :  { %2704 = vmatprep.subr.bf16.mxu1 %v3618_v61  ;;  %2728 = vmatprep.subr.bf16.mxu0 %v3143_v44 }
 0x23b   :  { %2706 = vmatpush1.bf16.msra.mxu1 %v3632_v3  ;;  %2730 = vmatpush3.bf16.msra.mxu0 %v3662_v11 }
 0x23c   :  { %2732 = vmatprep.subr.bf16.mxu1 %v3417_v42  ;;  %2763 = vmatprep.subr.bf16.mxu0 %v3143_v44 }
 0x2f1   :  { %v776_v8 = vpop.f32.mrb[2].mxu1  ;;  %v847_v15 = vpop.f32.mrb[18].mxu0 }
 0x2f2   :  { %v3016_v18 = vadd.f32 %v3723_v53, %v776_v8  ;;  %v778_v22 = vpop.f32.mrb[3].mxu1  ;;  %v2256_v41 = vpop.f32.mrb[19].mxu0  ;;  %v848_v10 = vadd.f32 %v847_v15, %v3729_v17 }
 0x2f3   :  { %v3018_v60 = vadd.f32 %v3725_v59, %v778_v22 }
 0x2f4   :  { %v1894_v55 = vmul.f32 -1.442695, %v3016_v18 }
 0x2f5   :  { %v1895_v63 = vmul.f32 -1.442695, %v3018_v60 }
 0x2f6   :  { %3072 = vpow2.f32 %v1894_v55 }
 0x2f7   :  { %3074 = vpow2.f32 %v1895_v63 }
 0x300   :  { %v3073_v0 = vpop.eup %3072 }
 0x301   :  { %v855_v5 = vadd.f32 1.0, %v3073_v0  ;;  %v3075_v6 = vpop.eup %3074 }
 0x302   :  { %v862_v9 = vadd.f32 1.0, %v3075_v6 }
 0x303   :  { %3076 = vrcp.f32 %v855_v5 }
 0x304   :  { %3078 = vrcp.f32 %v862_v9 }
 0x30d   :  { %v3077_v13 = vpop.eup %3076 }
 0x30e   :  { %v865_v14 = vmul.f32 %v3077_v13, %v848_v10  ;;  %v3079_v24 = vpop.eup %3078 }
 0x30f   :  { %v868_v26 = vsub.f32 1.0, %v3079_v24  ;;  %v870_v33 = vmul.f32 %v3079_v24, %v3733_v52 }
 0x310   :  { %v866_v19 = vadd.f32 %v865_v14, %v3706_v20 }
 0x312   :  { %3080 = vtanh.f32 %v866_v19 }
 0x31c   :  { %v3081_v29 = vpop.eup %3080 }
 0x31d   :  { %v869_v31 = vmul.f32 %v3081_v29, %v868_v26 }
 0x31f   :  { %v3781_v37 = vadd.f32 %v870_v33, %v869_v31 }
 0x321   :  { %1896 = vst [vmem:[%s4034_s8 + $0x8] sm:$0xff] %v3781_v37  ;;  %943 = vmatmul.mubr.f32.vlgmr.msra.gmra.mrb[4].mxu1 %v3781_v37  ;;  %2290 = vmatmul.mubr.f32.vlgmr.msra.gmra.mrb[20].mxu0 %v3781_v37 }
 0x322   :  { %2734 = vmatpush1.bf16.msra.mxu1 %v3445_v54  ;;  %2765 = vmatpush3.bf16.msra.mxu0 %v3463_v62 }
 0x323   :  { %2736 = vmatprep.subr.bf16.mxu1 %v3448_v56  ;;  %2766 = vmatprep.subr.bf16.mxu0 %v3143_v44 }
 0x324   :  { %1110 = vmatprep.mubr.f32.mxu1 %v3142_v43  ;;  %2324 = vmatprep.mubr.msk.f32.mxu0 %vm3144_vm0, %v3142_v43 }
 0x326   :  { %2738 = vmatpush1.bf16.msra.mxu1 %v3467_v2  ;;  %2768 = vmatpush3.bf16.msra.mxu0 %v3515_v21 }
 0x327   :  { %2740 = vmatprep.subr.bf16.mxu1 %v3472_v4  ;;  %2769 = vmatprep.subr.bf16.mxu0 %v3143_v44 }
 0x32a   :  { %2742 = vmatpush1.bf16.msra.mxu1 %v3494_v12  ;;  %2771 = vmatpush3.bf16.msra.mxu0 %v3545_v34 }
 0x32b   :  { %2744 = vmatprep.subr.bf16.mxu1 %v3500_v16  ;;  %2772 = vmatprep.subr.bf16.mxu0 %v3143_v44 }
 0x32e   :  { %2746 = vmatpush1.bf16.msra.mxu1 %v3519_v23  ;;  %2774 = vmatpush3.bf16.msra.mxu0 %v3576_v46 }
 0x32f   :  { %2748 = vmatprep.subr.bf16.mxu1 %v3528_v27  ;;  %2775 = vmatprep.subr.bf16.mxu0 %v3143_v44 }
 0x332   :  { %2750 = vmatpush1.bf16.msra.mxu1 %v3549_v35  ;;  %2777 = vmatpush3.bf16.msra.mxu0 %v3605_v57 }
 0x333   :  { %2752 = vmatprep.subr.bf16.mxu1 %v3558_v38  ;;  %2778 = vmatprep.subr.bf16.mxu0 %v3143_v44 }
 0x336   :  { %2754 = vmatpush1.bf16.msra.mxu1 %v3580_v47  ;;  %2780 = vmatpush3.bf16.msra.mxu0 %v3628_v1 }
 0x337   :  { %2756 = vmatprep.subr.bf16.mxu1 %v3589_v50  ;;  %2781 = vmatprep.subr.bf16.mxu0 %v3143_v44 }
 0x33a   :  { %2758 = vmatpush1.bf16.msra.mxu1 %v3609_v58  ;;  %2783 = vmatpush3.bf16.msra.mxu0 %v3643_v7 }
 0x33b   :  { %2760 = vmatprep.subr.bf16.mxu1 %v3618_v61  ;;  %2784 = vmatprep.subr.bf16.mxu0 %v3143_v44 }
 0x33e   :  { %2762 = vmatpush1.bf16.msra.mxu1 %v3632_v3  ;;  %2786 = vmatpush3.bf16.msra.mxu0 %v3662_v11 }
 0x33f   :  { %2788 = vmatprep.subr.bf16.mxu1 %v3417_v42  ;;  %2819 = vmatprep.subr.bf16.mxu0 %v3143_v44 }
 0x3f4   :  { %v944_v20 = vpop.f32.mrb[4].mxu1  ;;  %v1015_v40 = vpop.f32.mrb[20].mxu0 }
 0x3f5   :  { %v3020_v45 = vadd.f32 %v3723_v53, %v944_v20  ;;  %v946_v48 = vpop.f32.mrb[5].mxu1  ;;  %v2291_v49 = vpop.f32.mrb[21].mxu0  ;;  %v1016_v55 = vadd.f32 %v1015_v40, %v3729_v17 }
 0x3f6   :  { %v3022_v52 = vadd.f32 %v3725_v59, %v946_v48 }
 0x3f7   :  { %v1897_v51 = vmul.f32 -1.442695, %v3020_v45 }
 0x3f8   :  { %v1898_v8 = vmul.f32 -1.442695, %v3022_v52 }
 0x3f9   :  { %3082 = vpow2.f32 %v1897_v51 }
 0x3fa   :  { %3084 = vpow2.f32 %v1898_v8 }
 0x403   :  { %v3083_v15 = vpop.eup %3082 }
 0x404   :  { %v1023_v18 = vadd.f32 1.0, %v3083_v15  ;;  %v3085_v22 = vpop.eup %3084 }
 0x405   :  { %v1030_v41 = vadd.f32 1.0, %v3085_v22 }
 0x406   :  { %3086 = vrcp.f32 %v1023_v18 }
 0x407   :  { %3088 = vrcp.f32 %v1030_v41 }
 0x410   :  { %v3087_v60 = vpop.eup %3086 }
 0x411   :  { %v1033_v63 = vmul.f32 %v3087_v60, %v1016_v55  ;;  %v3089_v5 = vpop.eup %3088 }
 0x412   :  { %v1036_v6 = vsub.f32 1.0, %v3089_v5  ;;  %v1038_v13 = vmul.f32 %v3089_v5, %v3781_v37 }
 0x413   :  { %v1034_v0 = vadd.f32 %v1033_v63, %v3710_v28 }
 0x415   :  { %3090 = vtanh.f32 %v1034_v0 }
 0x41f   :  { %v3091_v9 = vpop.eup %3090 }
 0x420   :  { %v1037_v10 = vmul.f32 %v3091_v9, %v1036_v6 }
 0x422   :  { %v3829_v14 = vadd.f32 %v1038_v13, %v1037_v10 }
 0x424   :  { %1899 = vst [vmem:[%s4034_s8 + $0x10] sm:$0xff] %v3829_v14  ;;  %1111 = vmatmul.mubr.f32.vlgmr.msra.gmra.mrb[6].mxu1 %v3829_v14  ;;  %2325 = vmatmul.mubr.f32.vlgmr.msra.gmra.mrb[22].mxu0 %v3829_v14 }
 0x425   :  { %2790 = vmatpush1.bf16.msra.mxu1 %v3445_v54  ;;  %2821 = vmatpush3.bf16.msra.mxu0 %v3463_v62 }
 0x426   :  { %2792 = vmatprep.subr.bf16.mxu1 %v3448_v56  ;;  %2822 = vmatprep.subr.bf16.mxu0 %v3143_v44 }
 0x427   :  { %1278 = vmatprep.mubr.f32.mxu1 %v3142_v43  ;;  %2359 = vmatprep.mubr.msk.f32.mxu0 %vm3144_vm0, %v3142_v43 }
 0x429   :  { %2794 = vmatpush1.bf16.msra.mxu1 %v3467_v2  ;;  %2824 = vmatpush3.bf16.msra.mxu0 %v3515_v21 }
 0x42a   :  { %2796 = vmatprep.subr.bf16.mxu1 %v3472_v4  ;;  %2825 = vmatprep.subr.bf16.mxu0 %v3143_v44 }
 0x42d   :  { %2798 = vmatpush1.bf16.msra.mxu1 %v3494_v12  ;;  %2827 = vmatpush3.bf16.msra.mxu0 %v3545_v34 }
 0x42e   :  { %2800 = vmatprep.subr.bf16.mxu1 %v3500_v16  ;;  %2828 = vmatprep.subr.bf16.mxu0 %v3143_v44 }
 0x431   :  { %2802 = vmatpush1.bf16.msra.mxu1 %v3519_v23  ;;  %2830 = vmatpush3.bf16.msra.mxu0 %v3576_v46 }
 0x432   :  { %2804 = vmatprep.subr.bf16.mxu1 %v3528_v27  ;;  %2831 = vmatprep.subr.bf16.mxu0 %v3143_v44 }
 0x435   :  { %2806 = vmatpush1.bf16.msra.mxu1 %v3549_v35  ;;  %2833 = vmatpush3.bf16.msra.mxu0 %v3605_v57 }
 0x436   :  { %2808 = vmatprep.subr.bf16.mxu1 %v3558_v38  ;;  %2834 = vmatprep.subr.bf16.mxu0 %v3143_v44 }
 0x439   :  { %2810 = vmatpush1.bf16.msra.mxu1 %v3580_v47  ;;  %2836 = vmatpush3.bf16.msra.mxu0 %v3628_v1 }
 0x43a   :  { %2812 = vmatprep.subr.bf16.mxu1 %v3589_v50  ;;  %2837 = vmatprep.subr.bf16.mxu0 %v3143_v44 }
 0x43d   :  { %2814 = vmatpush1.bf16.msra.mxu1 %v3609_v58  ;;  %2839 = vmatpush3.bf16.msra.mxu0 %v3643_v7 }
 0x43e   :  { %2816 = vmatprep.subr.bf16.mxu1 %v3618_v61  ;;  %2840 = vmatprep.subr.bf16.mxu0 %v3143_v44 }
 0x441   :  { %2818 = vmatpush1.bf16.msra.mxu1 %v3632_v3  ;;  %2842 = vmatpush3.bf16.msra.mxu0 %v3662_v11 }
 0x442   :  { %2844 = vmatprep.subr.bf16.mxu1 %v3417_v42  ;;  %2875 = vmatprep.subr.bf16.mxu0 %v3143_v44 }
 0x4f7   :  { %v1112_v28 = vpop.f32.mrb[6].mxu1  ;;  %v1183_v19 = vpop.f32.mrb[22].mxu0 }
 0x4f8   :  { %v3024_v24 = vadd.f32 %v3723_v53, %v1112_v28  ;;  %v1114_v26 = vpop.f32.mrb[7].mxu1  ;;  %v2326_v29 = vpop.f32.mrb[23].mxu0  ;;  %v1184_v49 = vadd.f32 %v1183_v19, %v3729_v17 }
 0x4f9   :  { %v3026_v33 = vadd.f32 %v3725_v59, %v1114_v26 }
 0x4fa   :  { %v1900_v31 = vmul.f32 -1.442695, %v3024_v24 }
 0x4fb   :  { %v1901_v37 = vmul.f32 -1.442695, %v3026_v33 }
 0x4fc   :  { %3092 = vpow2.f32 %v1900_v31 }
 0x4fd   :  { %3094 = vpow2.f32 %v1901_v37 }
 0x506   :  { %v3093_v20 = vpop.eup %3092 }
 0x507   :  { %v1191_v40 = vadd.f32 1.0, %v3093_v20  ;;  %v3095_v45 = vpop.eup %3094 }
 0x508   :  { %v1198_v48 = vadd.f32 1.0, %v3095_v45 }
 0x509   :  { %3096 = vrcp.f32 %v1191_v40 }
 0x50a   :  { %3098 = vrcp.f32 %v1198_v48 }
 0x513   :  { %v3097_v51 = vpop.eup %3096 }
 0x514   :  { %v1201_v52 = vmul.f32 %v3097_v51, %v1184_v49  ;;  %v3099_v15 = vpop.eup %3098 }
 0x515   :  { %v1204_v18 = vsub.f32 1.0, %v3099_v15  ;;  %v1206_v55 = vmul.f32 %v3099_v15, %v3829_v14 }
 0x516   :  { %v1202_v8 = vadd.f32 %v1201_v52, %v3708_v25 }
 0x518   :  { %3100 = vtanh.f32 %v1202_v8 }
 0x522   :  { %v3101_v22 = vpop.eup %3100 }
 0x523   :  { %v1205_v41 = vmul.f32 %v3101_v22, %v1204_v18 }
 0x525   :  { %v3877_v60 = vadd.f32 %v1206_v55, %v1205_v41 }
 0x527   :  { %1902 = vst [vmem:[%s4034_s8 + $0x18] sm:$0xff] %v3877_v60  ;;  %1279 = vmatmul.mubr.f32.vlgmr.msra.gmra.mrb[8].mxu1 %v3877_v60  ;;  %2360 = vmatmul.mubr.f32.vlgmr.msra.gmra.mrb[24].mxu0 %v3877_v60 }
 0x528   :  { %2846 = vmatpush1.bf16.msra.mxu1 %v3445_v54  ;;  %2877 = vmatpush3.bf16.msra.mxu0 %v3463_v62 }
 0x529   :  { %2848 = vmatprep.subr.bf16.mxu1 %v3448_v56  ;;  %2878 = vmatprep.subr.bf16.mxu0 %v3143_v44 }
 0x52a   :  { %1446 = vmatprep.mubr.f32.mxu1 %v3142_v43  ;;  %2394 = vmatprep.mubr.msk.f32.mxu0 %vm3144_vm0, %v3142_v43 }
 0x52c   :  { %2850 = vmatpush1.bf16.msra.mxu1 %v3467_v2  ;;  %2880 = vmatpush3.bf16.msra.mxu0 %v3515_v21 }
 0x52d   :  { %2852 = vmatprep.subr.bf16.mxu1 %v3472_v4  ;;  %2881 = vmatprep.subr.bf16.mxu0 %v3143_v44 }
 0x530   :  { %2854 = vmatpush1.bf16.msra.mxu1 %v3494_v12  ;;  %2883 = vmatpush3.bf16.msra.mxu0 %v3545_v34 }
 0x531   :  { %2856 = vmatprep.subr.bf16.mxu1 %v3500_v16  ;;  %2884 = vmatprep.subr.bf16.mxu0 %v3143_v44 }
 0x534   :  { %2858 = vmatpush1.bf16.msra.mxu1 %v3519_v23  ;;  %2886 = vmatpush3.bf16.msra.mxu0 %v3576_v46 }
 0x535   :  { %2860 = vmatprep.subr.bf16.mxu1 %v3528_v27  ;;  %2887 = vmatprep.subr.bf16.mxu0 %v3143_v44 }
 0x538   :  { %2862 = vmatpush1.bf16.msra.mxu1 %v3549_v35  ;;  %2889 = vmatpush3.bf16.msra.mxu0 %v3605_v57 }
 0x539   :  { %2864 = vmatprep.subr.bf16.mxu1 %v3558_v38  ;;  %2890 = vmatprep.subr.bf16.mxu0 %v3143_v44 }
 0x53c   :  { %2866 = vmatpush1.bf16.msra.mxu1 %v3580_v47  ;;  %2892 = vmatpush3.bf16.msra.mxu0 %v3628_v1 }
 0x53d   :  { %2868 = vmatprep.subr.bf16.mxu1 %v3589_v50  ;;  %2893 = vmatprep.subr.bf16.mxu0 %v3143_v44 }
 0x540   :  { %2870 = vmatpush1.bf16.msra.mxu1 %v3609_v58  ;;  %2895 = vmatpush3.bf16.msra.mxu0 %v3643_v7 }
 0x541   :  { %2872 = vmatprep.subr.bf16.mxu1 %v3618_v61  ;;  %2896 = vmatprep.subr.bf16.mxu0 %v3143_v44 }
 0x544   :  { %2874 = vmatpush1.bf16.msra.mxu1 %v3632_v3  ;;  %2898 = vmatpush3.bf16.msra.mxu0 %v3662_v11 }
 0x545   :  { %2900 = vmatprep.subr.bf16.mxu1 %v3417_v42  ;;  %2931 = vmatprep.subr.bf16.mxu0 %v3143_v44 }
 0x5fa   :  { %v1280_v25 = vpop.f32.mrb[8].mxu1  ;;  %v1351_v63 = vpop.f32.mrb[24].mxu0 }
 0x5fb   :  { %v3028_v0 = vadd.f32 %v3723_v53, %v1280_v25  ;;  %v1282_v5 = vpop.f32.mrb[9].mxu1  ;;  %v2361_v6 = vpop.f32.mrb[25].mxu0  ;;  %v1352_v26 = vadd.f32 %v1351_v63, %v3729_v17 }
 0x5fc   :  { %v3030_v10 = vadd.f32 %v3725_v59, %v1282_v5 }
 0x5fd   :  { %v1903_v9 = vmul.f32 -1.442695, %v3028_v0 }
 0x5fe   :  { %v1904_v13 = vmul.f32 -1.442695, %v3030_v10 }
 0x5ff   :  { %3102 = vpow2.f32 %v1903_v9 }
 0x600   :  { %3104 = vpow2.f32 %v1904_v13 }
 0x609   :  { %v3103_v14 = vpop.eup %3102 }
 0x60a   :  { %v1359_v28 = vadd.f32 1.0, %v3103_v14  ;;  %v3105_v19 = vpop.eup %3104 }
 0x60b   :  { %v1366_v24 = vadd.f32 1.0, %v3105_v19 }
 0x60c   :  { %3106 = vrcp.f32 %v1359_v28 }
 0x60d   :  { %3108 = vrcp.f32 %v1366_v24 }
 0x616   :  { %v3107_v29 = vpop.eup %3106 }
 0x617   :  { %v1369_v31 = vmul.f32 %v3107_v29, %v1352_v26  ;;  %v3109_v37 = vpop.eup %3108 }
 0x618   :  { %v1372_v20 = vsub.f32 1.0, %v3109_v37  ;;  %v1374_v48 = vmul.f32 %v3109_v37, %v3877_v60 }
 0x619   :  { %v1370_v33 = vadd.f32 %v1369_v31, %v3714_v32 }
 0x61b   :  { %3110 = vtanh.f32 %v1370_v33 }
 0x625   :  { %v3111_v40 = vpop.eup %3110 }
 0x626   :  { %v1373_v45 = vmul.f32 %v3111_v40, %v1372_v20 }
 0x628   :  { %v3925_v49 = vadd.f32 %v1374_v48, %v1373_v45 }
 0x62a   :  { %1905 = vst [vmem:[%s4034_s8 + $0x20] sm:$0xff] %v3925_v49  ;;  %1447 = vmatmul.mubr.f32.vlgmr.msra.gmra.mrb[10].mxu1 %v3925_v49  ;;  %2395 = vmatmul.mubr.f32.vlgmr.msra.gmra.mrb[26].mxu0 %v3925_v49 }
 0x62b   :  { %2902 = vmatpush1.bf16.msra.mxu1 %v3445_v54  ;;  %2933 = vmatpush3.bf16.msra.mxu0 %v3463_v62 }
 0x62c   :  { %2904 = vmatprep.subr.bf16.mxu1 %v3448_v56  ;;  %2934 = vmatprep.subr.bf16.mxu0 %v3143_v44 }
 0x62d   :  { %1614 = vmatprep.mubr.f32.mxu1 %v3142_v43  ;;  %2429 = vmatprep.mubr.msk.f32.mxu0 %vm3144_vm0, %v3142_v43 }
 0x62f   :  { %2906 = vmatpush1.bf16.msra.mxu1 %v3467_v2  ;;  %2936 = vmatpush3.bf16.msra.mxu0 %v3515_v21 }
 0x630   :  { %2908 = vmatprep.subr.bf16.mxu1 %v3472_v4  ;;  %2937 = vmatprep.subr.bf16.mxu0 %v3143_v44 }
 0x633   :  { %2910 = vmatpush1.bf16.msra.mxu1 %v3494_v12  ;;  %2939 = vmatpush3.bf16.msra.mxu0 %v3545_v34 }
 0x634   :  { %2912 = vmatprep.subr.bf16.mxu1 %v3500_v16  ;;  %2940 = vmatprep.subr.bf16.mxu0 %v3143_v44 }
 0x637   :  { %2914 = vmatpush1.bf16.msra.mxu1 %v3519_v23  ;;  %2942 = vmatpush3.bf16.msra.mxu0 %v3576_v46 }
 0x638   :  { %2916 = vmatprep.subr.bf16.mxu1 %v3528_v27  ;;  %2943 = vmatprep.subr.bf16.mxu0 %v3143_v44 }
 0x63b   :  { %2918 = vmatpush1.bf16.msra.mxu1 %v3549_v35  ;;  %2945 = vmatpush3.bf16.msra.mxu0 %v3605_v57 }
 0x63c   :  { %2920 = vmatprep.subr.bf16.mxu1 %v3558_v38  ;;  %2946 = vmatprep.subr.bf16.mxu0 %v3143_v44 }
 0x63f   :  { %2922 = vmatpush1.bf16.msra.mxu1 %v3580_v47  ;;  %2948 = vmatpush3.bf16.msra.mxu0 %v3628_v1 }
 0x640   :  { %2924 = vmatprep.subr.bf16.mxu1 %v3589_v50  ;;  %2949 = vmatprep.subr.bf16.mxu0 %v3143_v44 }
 0x643   :  { %2926 = vmatpush1.bf16.msra.mxu1 %v3609_v58  ;;  %2951 = vmatpush3.bf16.msra.mxu0 %v3643_v7 }
 0x644   :  { %2928 = vmatprep.subr.bf16.mxu1 %v3618_v61  ;;  %2952 = vmatprep.subr.bf16.mxu0 %v3143_v44 }
 0x647   :  { %2930 = vmatpush1.bf16.msra.mxu1 %v3632_v3  ;;  %2954 = vmatpush3.bf16.msra.mxu0 %v3662_v11 }
 0x648   :  { %2956 = vmatprep.subr.bf16.mxu1 %v3417_v42  ;;  %2987 = vmatprep.subr.bf16.mxu0 %v3143_v44 }
 0x6fd   :  { %v1448_v32 = vpop.f32.mrb[10].mxu1  ;;  %v1519_v51 = vpop.f32.mrb[26].mxu0 }
 0x6fe   :  { %v3032_v52 = vadd.f32 %v3723_v53, %v1448_v32  ;;  %v1450_v8 = vpop.f32.mrb[11].mxu1  ;;  %v2396_v15 = vpop.f32.mrb[27].mxu0  ;;  %v1520_v42 = vadd.f32 %v1519_v51, %v3729_v17 }
 0x6ff   :  { %v3034_v22 = vadd.f32 %v3725_v59, %v1450_v8 }
 0x700   :  { %v1906_v18 = vmul.f32 -1.442695, %v3032_v52 }
 0x701   :  { %v1907_v41 = vmul.f32 -1.442695, %v3034_v22 }
 0x702   :  { %3112 = vpow2.f32 %v1906_v18 }
 0x703   :  { %3114 = vpow2.f32 %v1907_v41 }
 0x70c   :  { %v3113_v55 = vpop.eup %3112 }
 0x70d   :  { %v1527_v60 = vadd.f32 1.0, %v3113_v55  ;;  %v3115_v25 = vpop.eup %3114 }
 0x70e   :  { %v1534_v63 = vadd.f32 1.0, %v3115_v25 }
 0x70f   :  { %3116 = vrcp.f32 %v1527_v60 }
 0x710   :  { %3118 = vrcp.f32 %v1534_v63 }
 0x719   :  { %v3117_v0 = vpop.eup %3116 }
 0x71a   :  { %v1537_v5 = vmul.f32 %v3117_v0, %v1520_v42  ;;  %v3119_v9 = vpop.eup %3118 }
 0x71b   :  { %v1540_v10 = vsub.f32 1.0, %v3119_v9  ;;  %v1542_v28 = vmul.f32 %v3119_v9, %v3925_v49 }
 0x71c   :  { %v1538_v6 = vadd.f32 %v1537_v5, %v3712_v30 }
 0x71e   :  { %3120 = vtanh.f32 %v1538_v6 }
 0x728   :  { %v3121_v13 = vpop.eup %3120 }
 0x729   :  { %v1541_v14 = vmul.f32 %v3121_v13, %v1540_v10 }
 0x72b   :  { %v1543_v19 = vadd.f32 %v1542_v28, %v1541_v14 }
 0x72d   :  { %1908 = vst [vmem:[%s4034_s8 + $0x28] sm:$0xff] %v1543_v19  ;;  %1615 = vmatmul.mubr.f32.vlgmr.msra.gmra.mrb[12].mxu1 %v1543_v19  ;;  %2430 = vmatmul.mubr.f32.vlgmr.msra.gmra.mrb[28].mxu0 %v1543_v19 }
 0x72e   :  { %2958 = vmatpush1.bf16.msra.mxu1 %v3445_v54  ;;  %2989 = vmatpush3.bf16.msra.mxu0 %v3463_v62 }
 0x72f   :  { %2960 = vmatprep.subr.bf16.mxu1 %v3448_v56  ;;  %2990 = vmatprep.subr.bf16.mxu0 %v3143_v44 }
 0x730   :  { %1782 = vmatprep.mubr.f32.mxu1 %v3142_v43  ;;  %2464 = vmatprep.mubr.msk.f32.mxu0 %vm3144_vm0, %v3142_v43 }
 0x732   :  { %2962 = vmatpush1.bf16.msra.mxu1 %v3467_v2  ;;  %2992 = vmatpush3.bf16.msra.mxu0 %v3515_v21 }
 0x733   :  { %2964 = vmatprep.subr.bf16.mxu1 %v3472_v4  ;;  %2993 = vmatprep.subr.bf16.mxu0 %v3143_v44 }
 0x736   :  { %2966 = vmatpush1.bf16.msra.mxu1 %v3494_v12  ;;  %2995 = vmatpush3.bf16.msra.mxu0 %v3545_v34 }
 0x737   :  { %2968 = vmatprep.subr.bf16.mxu1 %v3500_v16  ;;  %2996 = vmatprep.subr.bf16.mxu0 %v3143_v44 }
 0x73a   :  { %2970 = vmatpush1.bf16.msra.mxu1 %v3519_v23  ;;  %2998 = vmatpush3.bf16.msra.mxu0 %v3576_v46 }
 0x73b   :  { %2972 = vmatprep.subr.bf16.mxu1 %v3528_v27  ;;  %2999 = vmatprep.subr.bf16.mxu0 %v3143_v44 }
 0x73e   :  { %2974 = vmatpush1.bf16.msra.mxu1 %v3549_v35  ;;  %3001 = vmatpush3.bf16.msra.mxu0 %v3605_v57 }
 0x73f   :  { %2976 = vmatprep.subr.bf16.mxu1 %v3558_v38  ;;  %3002 = vmatprep.subr.bf16.mxu0 %v3143_v44 }
 0x742   :  { %2978 = vmatpush1.bf16.msra.mxu1 %v3580_v47  ;;  %3004 = vmatpush3.bf16.msra.mxu0 %v3628_v1 }
 0x743   :  { %2980 = vmatprep.subr.bf16.mxu1 %v3589_v50  ;;  %3005 = vmatprep.subr.bf16.mxu0 %v3143_v44 }
 0x746   :  { %2982 = vmatpush1.bf16.msra.mxu1 %v3609_v58  ;;  %3007 = vmatpush3.bf16.msra.mxu0 %v3643_v7 }
 0x747   :  { %2984 = vmatprep.subr.bf16.mxu1 %v3618_v61  ;;  %3008 = vmatprep.subr.bf16.mxu0 %v3143_v44 }
 0x74a   :  { %2986 = vmatpush1.bf16.msra.mxu1 %v3632_v3  ;;  %3010 = vmatpush3.bf16.msra.mxu0 %v3662_v11 }
 0x800   :  { %v1616_v43 = vpop.f32.mrb[12].mxu1  ;;  %v1687_v54 = vpop.f32.mrb[28].mxu0 }
 0x801   :  { %v3036_v56 = vadd.f32 %v3723_v53, %v1616_v43  ;;  %v1618_v62 = vpop.f32.mrb[13].mxu1  ;;  %v2431_v2 = vpop.f32.mrb[29].mxu0  ;;  %v1688_v34 = vadd.f32 %v1687_v54, %v3729_v17 }
 0x802   :  { %v3038_v12 = vadd.f32 %v3725_v59, %v1618_v62 }
 0x803   :  { %v1909_v4 = vmul.f32 -1.442695, %v3036_v56 }
 0x804   :  { %v1910_v16 = vmul.f32 -1.442695, %v3038_v12 }
 0x805   :  { %3122 = vpow2.f32 %v1909_v4 }
 0x806   :  { %3124 = vpow2.f32 %v1910_v16 }
 0x80f   :  { %v3123_v21 = vpop.eup %3122 }
 0x810   :  { %v1695_v23 = vadd.f32 1.0, %v3123_v21  ;;  %v3125_v44 = vpop.eup %3124 }
 0x811   :  { %v1702_v27 = vadd.f32 1.0, %v3125_v44 }
 0x812   :  { %3126 = vrcp.f32 %v1695_v23 }
 0x813   :  { %3128 = vrcp.f32 %v1702_v27 }
 0x81c   :  { %v3127_v35 = vpop.eup %3126 }
 0x81d   :  { %v1705_v38 = vmul.f32 %v3127_v35, %v1688_v34  ;;  %v3129_v47 = vpop.eup %3128 }
 0x81e   :  { %v1708_v50 = vsub.f32 1.0, %v3129_v47  ;;  %v1710_v61 = vmul.f32 %v3129_v47, %v1543_v19 }
 0x81f   :  { %v1706_v46 = vadd.f32 %v1705_v38, %v3718_v39 }
 0x821   :  { %3130 = vtanh.f32 %v1706_v46 }
 0x82b   :  { %v3131_v57 = vpop.eup %3130 }
 0x82c   :  { %v1709_v58 = vmul.f32 %v3131_v57, %v1708_v50 }
 0x82e   :  { %v1711_v1 = vadd.f32 %v1710_v61, %v1709_v58 }
 0x830   :  { %1911 = vst [vmem:[%s4034_s8 + $0x30] sm:$0xff] %v1711_v1  ;;  %1783 = vmatmul.mubr.f32.vlgmr.msra.gmra.mrb[14].mxu1 %v1711_v1  ;;  %2465 = vmatmul.mubr.f32.vlgmr.msra.gmra.mrb[30].mxu0 %v1711_v1 }
 0x903   :  { %v1784_v3 = vpop.f32.mrb[14].mxu1  ;;  %v1855_v7 = vpop.f32.mrb[30].mxu0 }
 0x904   :  { %v3040_v11 = vadd.f32 %v3723_v53, %v1784_v3  ;;  %v1786_v30 = vpop.f32.mrb[15].mxu1  ;;  %v2466_v24 = vpop.f32.mrb[31].mxu0  ;;  %v1856_v40 = vadd.f32 %v1855_v7, %v3729_v17 }
 0x905   :  { %v3042_v26 = vadd.f32 %v3725_v59, %v1786_v30 }
 0x906   :  { %v1912_v39 = vmul.f32 -1.442695, %v3040_v11 }
 0x907   :  { %v1913_v29 = vmul.f32 -1.442695, %v3042_v26 }
 0x908   :  { %3132 = vpow2.f32 %v1912_v39 }
 0x909   :  { %3134 = vpow2.f32 %v1913_v29 }
 0x912   :  { %v3133_v31 = vpop.eup %3132 }
 0x913   :  { %v1863_v33 = vadd.f32 1.0, %v3133_v31  ;;  %v3135_v37 = vpop.eup %3134 }
 0x914   :  { %v1870_v20 = vadd.f32 1.0, %v3135_v37 }
 0x915   :  { %3136 = vrcp.f32 %v1863_v33 }
 0x916   :  { %3138 = vrcp.f32 %v1870_v20 }
 0x91f   :  { %v3137_v45 = vpop.eup %3136 }
 0x920   :  { %v1873_v48 = vmul.f32 %v3137_v45, %v1856_v40  ;;  %v3139_v49 = vpop.eup %3138 }
 0x921   :  { %v1876_v32 = vsub.f32 1.0, %v3139_v49  ;;  %v1878_v52 = vmul.f32 %v3139_v49, %v1711_v1 }
 0x922   :  { %v1874_v53 = vadd.f32 %v1873_v48, %v3716_v36 }
 0x924   :  { %3140 = vtanh.f32 %v1874_v53 }
 0x92e   :  { %v3141_v51 = vpop.eup %3140 }
 0x92f   :  { %v1877_v59 = vmul.f32 %v3141_v51, %v1876_v32 }
 0x931   :  { %v1879_v8 = vadd.f32 %v1878_v52, %v1877_v59 }
 0x933   :  { %1914 = vst [vmem:[%s4034_s8 + $0x38] sm:$0xff] %v1879_v8  ;;  %1882 = vst [vmem:[%s4035_s9] sm:$0xff] %v1879_v8 }

</bundles_post_ra>
